<compile_context>
chip_gen: v7x
topology: tpu7x:2x2x1
jax: 0.10.0
libtpu: 0.0.40
codegen_flags: <defaults>
</compile_context>

<pallas_src>
import functools

import jax
import jax.numpy as jnp
from jax.experimental import pallas as pl
from jax.experimental.pallas import tpu as pltpu


_SQRT_2_OVER_PI = 0.7978845608028654


def _gelu_tanh(x):
    # GELU(x) ~= 0.5 * x * (1 + tanh(sqrt(2/pi) * (x + 0.044715 * x^3)))
    return 0.5 * x * (1.0 + jnp.tanh(_SQRT_2_OVER_PI * (x + 0.044715 * x * x * x)))


def _round_up(n, m):
    return ((n + m - 1) // m) * m


# ----------------------------------------------------------------------------
# Fused MLP kernel: one row-tile of x -> one row-tile of y, hidden stays in VMEM
# ----------------------------------------------------------------------------
def _mlp_fused_kernel(x_ref, wfc_ref, bfc_ref, wproj_ref, bproj_ref, o_ref):
    # x_ref: (tm, C) | wfc_ref: (C, H) | bfc_ref: (1, H)
    # wproj_ref: (H, C) | bproj_ref: (1, C) | o_ref: (tm, C)
    h = jnp.dot(x_ref[...], wfc_ref[...], preferred_element_type=jnp.float32)
    h = _gelu_tanh(h + bfc_ref[...].astype(jnp.float32))      # f32 epilogue
    h = h.astype(wproj_ref.dtype)                              # bf16 back onto the MXU
    y = jnp.dot(h, wproj_ref[...], preferred_element_type=jnp.float32)
    y = y + bproj_ref[...].astype(jnp.float32)
    o_ref[...] = y.astype(o_ref.dtype)


# ----------------------------------------------------------------------------
# Wrapper: reshape, pad rows to the tile, run the fused kernel
# ----------------------------------------------------------------------------
def mlp_forward(x, params, *, tm=512, compute_dtype=jnp.bfloat16,
                vmem_limit_bytes=48 * 1024 * 1024):
    """x: (B, T, C) -> (B, T, C);  y = c_proj(GELU_tanh(c_fc(x)))."""
    B, T, C = x.shape
    H = params["w_fc_t"].shape[1]
    assert params["w_fc_t"].shape == (C, H)
    assert params["w_proj_t"].shape == (H, C)
    M = B * T
    out_dtype = x.dtype

    # Row tile: multiple of 8 sublanes, clamped to (padded) M for small inputs.
    tm_eff = min(tm, _round_up(M, 8))
    M_pad = _round_up(M, tm_eff)

    x2d = x.reshape(M, C).astype(compute_dtype)
    if M_pad != M:
        x2d = jnp.pad(x2d, ((0, M_pad - M), (0, 0)))

    w_fc = params["w_fc_t"].astype(compute_dtype)
    w_proj = params["w_proj_t"].astype(compute_dtype)
    b_fc = params["b_fc"].reshape(1, H).astype(jnp.float32)
    b_proj = params["b_proj"].reshape(1, C).astype(jnp.float32)

    cw = jnp.dtype(compute_dtype).itemsize
    cost = pl.CostEstimate(
        flops=2 * 2 * M_pad * C * H,                 # two GEMMs
        transcendentals=M_pad * H,                   # tanh in GELU
        bytes_accessed=(2 * M_pad * C) * cw          # x in + y out
        + (2 * C * H) * cw                           # both weights (read once)
        + 4 * (H + C),                               # biases (f32)
    )

    grid = (M_pad // tm_eff,)
    y2d = pl.pallas_call(
        _mlp_fused_kernel,
        out_shape=jax.ShapeDtypeStruct((M_pad, C), out_dtype),
        grid_spec=pltpu.PrefetchScalarGridSpec(
            num_scalar_prefetch=0,
            grid=grid,
            in_specs=[
                pl.BlockSpec((tm_eff, C), lambda i: (i, 0)),   # x row tile (pipelined)
                pl.BlockSpec((C, H), lambda i: (0, 0)),        # W_fc   (VMEM-resident)
                pl.BlockSpec((1, H), lambda i: (0, 0)),        # b_fc   (VMEM-resident)
                pl.BlockSpec((H, C), lambda i: (0, 0)),        # W_proj (VMEM-resident)
                pl.BlockSpec((1, C), lambda i: (0, 0)),        # b_proj (VMEM-resident)
            ],
            out_specs=pl.BlockSpec((tm_eff, C), lambda i: (i, 0)),
        ),
        compiler_params=pltpu.CompilerParams(
            # Single row-tile axis; independent tiles -> megacore can shard it.
            dimension_semantics=("parallel",),
            vmem_limit_bytes=vmem_limit_bytes,  # safe for v7x's 64 MiB; raise to ~96 MiB on v5e/v6e
        ),
        cost_estimate=cost,
    )(x2d, w_fc, b_fc, w_proj, b_proj)

    return y2d[:M].reshape(B, T, C)


# ----------------------------------------------------------------------------
# Pure-JAX reference (module semantics, f32)
# ----------------------------------------------------------------------------
def reference(x, params):
    h = x @ params["w_fc_t"] + params["b_fc"]
    h = 0.5 * h * (1.0 + jnp.tanh(_SQRT_2_OVER_PI * (h + 0.044715 * h ** 3)))
    return h @ params["w_proj_t"] + params["b_proj"]


if __name__ == "__main__":
    # Small config consistent with the module: hidden = 4 * n_embd
    B, T, C = 2, 128, 64
    H = 4 * C

    key = jax.random.PRNGKey(0)
    kx, k1, k2, k3, k4 = jax.random.split(key, 5)

    x = jax.random.normal(kx, (B, T, C), dtype=jnp.float32)

    # PyTorch Linear stores weight as (out, in); we keep the transposed (in, out)
    # layout so the kernel computes x @ W^T directly.
    params = {
        "w_fc_t": jax.random.normal(k1, (C, H), dtype=jnp.float32) * 0.02,
        "b_fc": jax.random.normal(k2, (H,), dtype=jnp.float32) * 0.02,
        "w_proj_t": jax.random.normal(k3, (H, C), dtype=jnp.float32) * 0.02,
        "b_proj": jax.random.normal(k4, (C,), dtype=jnp.float32) * 0.02,
    }

    y = mlp_forward(x, params)          # bf16 compute, f32 accumulate, f32 out
    y = jax.block_until_ready(y)

    y_ref = reference(x, params)
    assert y.shape == (B, T, C)
    assert bool(jnp.all(jnp.isfinite(y))), "non-finite output"
    # bf16 operands on the MXU -> modest tolerance vs the f32 reference.
    assert jnp.allclose(y, y_ref, atol=1e-2, rtol=5e-2), "mismatch vs reference"

    print("KERNEL_OK")
</pallas_src>

<mosaic_0001>
module attributes {stable_mosaic.version = 11 : i64} {
  func.func @_mlp_fused_kernel(%arg0: i32, %arg1: memref<256x64xbf16, #tpu.memory_space<vmem>>, %arg2: memref<64x256xbf16, #tpu.memory_space<vmem>>, %arg3: memref<1x256xf32, #tpu.memory_space<vmem>>, %arg4: memref<256x64xbf16, #tpu.memory_space<vmem>>, %arg5: memref<1x64xf32, #tpu.memory_space<vmem>>, %arg6: memref<256x64xf32, #tpu.memory_space<vmem>>) attributes {dimension_semantics = [#tpu.dimension_semantics<parallel>], iteration_bounds = array<i64: 1>, scalar_prefetch = 0 : i64, scratch_operands = 0 : i64, tpu.core_type = #tpu.core_type<tc>, window_params = [{transform_indices = @transform_0, window_bounds = array<i64: 256, 64>}, {pipeline_mode = #tpu.pipeline_mode<synchronous>, transform_indices = @transform_1, window_bounds = array<i64: 64, 256>}, {pipeline_mode = #tpu.pipeline_mode<synchronous>, transform_indices = @transform_2, window_bounds = array<i64: 1, 256>}, {pipeline_mode = #tpu.pipeline_mode<synchronous>, transform_indices = @transform_3, window_bounds = array<i64: 256, 64>}, {pipeline_mode = #tpu.pipeline_mode<synchronous>, transform_indices = @transform_4, window_bounds = array<i64: 1, 64>}, {transform_indices = @transform_5, window_bounds = array<i64: 256, 64>}]} {
    %c0 = arith.constant 0 : index
    %c0_0 = arith.constant 0 : index
    %0 = vector.load %arg1[%c0, %c0_0] : memref<256x64xbf16, #tpu.memory_space<vmem>>, vector<256x64xbf16>
    %c0_1 = arith.constant 0 : index
    %c0_2 = arith.constant 0 : index
    %1 = vector.load %arg2[%c0_1, %c0_2] : memref<64x256xbf16, #tpu.memory_space<vmem>>, vector<64x256xbf16>
    %cst = arith.constant dense<0.000000e+00> : vector<256x256xf32>
    %2 = tpu.matmul %0, %1, %cst {dimension_numbers = #tpu.dot_dimension_numbers<[1], [0], [0], [1], [0, 0, 1, 1], [], []>} : vector<256x64xbf16>, vector<64x256xbf16>, vector<256x256xf32> -> vector<256x256xf32>
    %c0_3 = arith.constant 0 : index
    %c0_4 = arith.constant 0 : index
    %3 = vector.load %arg3[%c0_3, %c0_4] : memref<1x256xf32, #tpu.memory_space<vmem>>, vector<1x256xf32>
    %4 = vector.broadcast %3 : vector<1x256xf32> to vector<256x256xf32>
    %5 = arith.addf %2, %4 : vector<256x256xf32>
    %cst_5 = arith.constant 5.000000e-01 : f32
    %6 = vector.broadcast %cst_5 : f32 to vector<256x256xf32>
    %7 = arith.mulf %6, %5 : vector<256x256xf32>
    %cst_6 = arith.constant 4.471500e-02 : f32
    %8 = vector.broadcast %cst_6 : f32 to vector<256x256xf32>
    %9 = arith.mulf %8, %5 : vector<256x256xf32>
    %10 = arith.mulf %9, %5 : vector<256x256xf32>
    %11 = arith.mulf %10, %5 : vector<256x256xf32>
    %12 = arith.addf %5, %11 : vector<256x256xf32>
    %cst_7 = arith.constant 0.797884583 : f32
    %13 = vector.broadcast %cst_7 : f32 to vector<256x256xf32>
    %14 = arith.mulf %13, %12 : vector<256x256xf32>
    %15 = math.tanh %14 : vector<256x256xf32>
    %cst_8 = arith.constant 1.000000e+00 : f32
    %16 = vector.broadcast %cst_8 : f32 to vector<256x256xf32>
    %17 = arith.addf %16, %15 : vector<256x256xf32>
    %18 = arith.mulf %7, %17 : vector<256x256xf32>
    %19 = arith.truncf %18 : vector<256x256xf32> to vector<256x256xbf16>
    %c0_9 = arith.constant 0 : index
    %c0_10 = arith.constant 0 : index
    %20 = vector.load %arg4[%c0_9, %c0_10] : memref<256x64xbf16, #tpu.memory_space<vmem>>, vector<256x64xbf16>
    %cst_11 = arith.constant dense<0.000000e+00> : vector<256x64xf32>
    %21 = tpu.matmul %19, %20, %cst_11 {dimension_numbers = #tpu.dot_dimension_numbers<[1], [0], [0], [1], [0, 0, 1, 1], [], []>} : vector<256x256xbf16>, vector<256x64xbf16>, vector<256x64xf32> -> vector<256x64xf32>
    %c0_12 = arith.constant 0 : index
    %c0_13 = arith.constant 0 : index
    %22 = vector.load %arg5[%c0_12, %c0_13] : memref<1x64xf32, #tpu.memory_space<vmem>>, vector<1x64xf32>
    %23 = vector.broadcast %22 : vector<1x64xf32> to vector<256x64xf32>
    %24 = arith.addf %21, %23 : vector<256x64xf32>
    %c0_14 = arith.constant 0 : index
    %c0_15 = arith.constant 0 : index
    %25 = vector.load %arg6[%c0_14, %c0_15] : memref<256x64xf32, #tpu.memory_space<vmem>>, vector<256x64xf32>
    tpu.vector_store %arg6[%c0_14, %c0_15], %24 {strides = array<i32>} : memref<256x64xf32, #tpu.memory_space<vmem>>, vector<256x64xf32>,
    return
  }
  func.func @transform_0(%arg0: i32) -> (i32, i32) {
    %c0_i32 = arith.constant 0 : i32
    %c0_i32_0 = arith.constant 0 : i32
    return %arg0, %c0_i32 : i32, i32
  }
  func.func @transform_1(%arg0: i32) -> (i32, i32) {
    %c0_i32 = arith.constant 0 : i32
    %c0_i32_0 = arith.constant 0 : i32
    %c0_i32_1 = arith.constant 0 : i32
    return %c0_i32, %c0_i32_0 : i32, i32
  }
  func.func @transform_2(%arg0: i32) -> (i32, i32) {
    %c0_i32 = arith.constant 0 : i32
    %c0_i32_0 = arith.constant 0 : i32
    %c0_i32_1 = arith.constant 0 : i32
    return %c0_i32, %c0_i32_0 : i32, i32
  }
  func.func @transform_3(%arg0: i32) -> (i32, i32) {
    %c0_i32 = arith.constant 0 : i32
    %c0_i32_0 = arith.constant 0 : i32
    %c0_i32_1 = arith.constant 0 : i32
    return %c0_i32, %c0_i32_0 : i32, i32
  }
  func.func @transform_4(%arg0: i32) -> (i32, i32) {
    %c0_i32 = arith.constant 0 : i32
    %c0_i32_0 = arith.constant 0 : i32
    %c0_i32_1 = arith.constant 0 : i32
    return %c0_i32, %c0_i32_0 : i32, i32
  }
  func.func @transform_5(%arg0: i32) -> (i32, i32) {
    %c0_i32 = arith.constant 0 : i32
    %c0_i32_0 = arith.constant 0 : i32
    return %arg0, %c0_i32 : i32, i32
  }
}

</mosaic_0001>

<bundles_post_ra>
// kernel: tpu_custom_call.1
= control target key start
LH: loop header
LB: loop body
LE: loop exit
PB: predicated region body
PF: predicated region fallthrough
CT: control target
= control target key end

     0   :  { %v1733_v1 = vmov 0   ;;  %vm193_vm0 = vcmask 523264   ;;  %v63_v41 = vlaneseq  ;;  %s2786_s1 = inlined_call_operand.vmem [shape: bf16[64,256], index: 1, kind: input, shape index: {}]   ;;  %s2787_s0 = inlined_call_operand.vmem [shape: bf16[256,64], index: 0, kind: input, shape index: {}]   ;;  %s2788_s3 = inlined_call_operand.vmem [shape: bf16[256,64], index: 3, kind: input, shape index: {}]   ;;  %s2789_s2 = inlined_call_operand.vmem [shape: f32[1,256], index: 2, kind: input, shape index: {}]   ;;  %s2790_s4 = inlined_call_operand.vmem [shape: f32[1,64], index: 4, kind: input, shape index: {}]   ;;  %s2791_s5 = inlined_call_operand.vmem [shape: f32[256,64], index: 5, kind: output, shape index: {}]  }
   0x1   :  { %v1561_v0 = vld [vmem:[%s2786_s1 + $0x4] ss:$8 sps:$4 sm:$0xff]   ;;  %274 = vmatprep.mubr.bf16.mxu0 %v1733_v1  ;;  %v1563_v2 = vld [vmem:[%s2786_s1] ss:$8 sps:$4 sm:$0xff]   ;;  %v1564_v3 = vld [vmem:[%s2786_s1 + $0x14] ss:$8 sps:$4 sm:$0xff]  }
   0x2   :  { %242 = vmatprep.subr.bf16.mxu0 %v1561_v0  ;;  %v1566_v4 = vld [vmem:[%s2786_s1 + $0x10] ss:$8 sps:$4 sm:$0xff]   ;;  %v1567_v5 = vld [vmem:[%s2786_s1 + $0x24] ss:$8 sps:$4 sm:$0xff]   ;;  %v1569_v6 = vld [vmem:[%s2786_s1 + $0x20] ss:$8 sps:$4 sm:$0xff]  }
   0x3   :  { %243 = vmatpush1.bf16.msra.mxu0 %v1563_v2  ;;  %v1570_v7 = vld [vmem:[%s2786_s1 + $0x34] ss:$8 sps:$4 sm:$0xff]   ;;  %v1572_v8 = vld [vmem:[%s2786_s1 + $0x30] ss:$8 sps:$4 sm:$0xff]   ;;  %v1573_v9 = vld [vmem:[%s2787_s0] sm:$0xff]   ;;  %v64_v42 = vshrl.u32 %v63_v41, 7 }
   0x4   :  { %244 = vmatprep.subr.bf16.mxu0 %v1564_v3  ;;  %v1574_v10 = vld [vmem:[%s2787_s0 + $0x8] sm:$0xff]   ;;  %v1575_v11 = vld [vmem:[%s2787_s0 + $0x10] sm:$0xff]   ;;  %v1576_v12 = vld [vmem:[%s2787_s0 + $0x18] sm:$0xff]  }
   0x5   :  { %v1577_v13 = vld [vmem:[%s2787_s0 + $0x20] sm:$0xff]   ;;  %v1578_v14 = vld [vmem:[%s2787_s0 + $0x28] sm:$0xff]   ;;  %v1579_v15 = vld [vmem:[%s2787_s0 + $0x30] sm:$0xff]   ;;  %v65_v43 = vsub.s32 0, %v64_v42  ;;  %v69_v45 = vsub.s32 1, %v64_v42 }
   0x6   :  { %v1580_v16 = vld [vmem:[%s2787_s0 + $0x38] sm:$0xff]   ;;  %v1581_v17 = vld [vmem:[%s2787_s0 + $0x40] sm:$0xff]   ;;  %v1582_v18 = vld [vmem:[%s2787_s0 + $0x48] sm:$0xff]  }
   0x7   :  { %245 = vmatpush1.bf16.msra.mxu0 %v1566_v4  ;;  %v1583_v19 = vld [vmem:[%s2787_s0 + $0x50] sm:$0xff]   ;;  %v1584_v20 = vld [vmem:[%s2787_s0 + $0x58] sm:$0xff]   ;;  %v1589_v21 = vld [vmem:[%s2788_s3 + $0x40] sm:$0xff]  }
   0x8   :  { %246 = vmatprep.subr.bf16.mxu0 %v1567_v5  ;;  %v1590_v22 = vld [vmem:[%s2788_s3] sm:$0xff]   ;;  %1544 = vmatprep.subr.bf16.mxu1 %v1589_v21  ;;  %v1591_v23 = vld [vmem:[%s2788_s3 + $0x48] sm:$0xff]   ;;  %v1593_v26 = vld [vmem:[%s2788_s3 + $0x50] sm:$0xff]  }
   0x9   :  { %1552 = vmatpush3.bf16.msra.mxu1 %v1590_v22  ;;  %v1592_v24 = vld [vmem:[%s2788_s3 + $0x8] sm:$0xff]   ;;  %v1585_v25 = vld [vmem:[%s2787_s0 + $0x60] sm:$0xff]   ;;  %v1594_v27 = vld [vmem:[%s2788_s3 + $0x10] sm:$0xff]  }
   0xa   :  { %1545 = vmatprep.subr.bf16.mxu1 %v1591_v23  ;;  %v1595_v28 = vld [vmem:[%s2788_s3 + $0x58] sm:$0xff]   ;;  %v1597_v30 = vld [vmem:[%s2788_s3 + $0x60] sm:$0xff]   ;;  %v1586_v31 = vld [vmem:[%s2787_s0 + $0x68] sm:$0xff]  }
   0xb   :  { %247 = vmatpush1.bf16.msra.mxu0 %v1569_v6  ;;  %v1596_v29 = vld [vmem:[%s2788_s3 + $0x18] sm:$0xff]   ;;  %v1598_v32 = vld [vmem:[%s2788_s3 + $0x20] sm:$0xff]   ;;  %v1599_v33 = vld [vmem:[%s2788_s3 + $0x68] sm:$0xff]  }
   0xc   :  { %248 = vmatprep.subr.bf16.mxu0 %v1570_v7  ;;  %v1600_v34 = vld [vmem:[%s2788_s3 + $0x28] sm:$0xff]   ;;  %v1601_v35 = vld [vmem:[%s2788_s3 + $0x70] sm:$0xff]   ;;  %v1603_v38 = vld [vmem:[%s2788_s3 + $0x78] sm:$0xff]  }
   0xd   :  { %1553 = vmatpush3.bf16.msra.mxu1 %v1592_v24  ;;  %v1587_v36 = vld [vmem:[%s2787_s0 + $0x70] sm:$0xff]   ;;  %v1604_v39 = vld [vmem:[%s2788_s3 + $0x38] sm:$0xff]   ;;  %v61_v44 = vld [vmem:[%s2789_s2] sm:$0x3] }
   0xe   :  { %1546 = vmatprep.subr.bf16.mxu1 %v1593_v26  ;;  %v1602_v37 = vld [vmem:[%s2788_s3 + $0x30] sm:$0xff]   ;;  %v1588_v40 = vld [vmem:[%s2787_s0 + $0x78] sm:$0xff]   ;;  %v1919_v46 = vrot.slane %v61_v44, %v65_v43  ;;  %v1921_v47 = vrot.slane %v61_v44, %v69_v45 }
   0xf   :  { %249 = vmatpush1.bf16.msra.mxu0 %v1572_v8 }
  0x10   :  { %1432 = vmatprep.subr.bf16.mxu0 %v1589_v21 }
  0x11   :  { %1554 = vmatpush3.bf16.msra.mxu1 %v1594_v27 }
  0x12   :  { %1399 = vmatmul.mubr.msk.bf16.vlgmr.msra.gmra.mrb[0].mxu0 %vm193_vm0, %v1573_v9  ;;  %1547 = vmatprep.subr.bf16.mxu1 %v1595_v28 }
  0x13   :  { %284 = vmatprep.mubr.bf16.mxu0 %v1733_v1  ;;  %1433 = vmatpush3.bf16.msra.mxu0 %v1590_v22 }
  0x14   :  { %1434 = vmatprep.subr.bf16.mxu0 %v1591_v23 }
  0x15   :  { %1555 = vmatpush3.bf16.msra.mxu1 %v1596_v29 }
  0x16   :  { %1548 = vmatprep.subr.bf16.mxu1 %v1597_v30 }
  0x17   :  { %1435 = vmatpush3.bf16.msra.mxu0 %v1592_v24 }
  0x18   :  { %1436 = vmatprep.subr.bf16.mxu0 %v1593_v26 }
  0x19   :  { %1556 = vmatpush3.bf16.msra.mxu1 %v1598_v32 }
  0x1a   :  { %1400 = vmatmul.mubr.msk.bf16.gmra.mrb[4].mxu0 %vm193_vm0, %v1574_v10  ;;  %1549 = vmatprep.subr.bf16.mxu1 %v1599_v33 }
  0x1b   :  { %294 = vmatprep.mubr.bf16.mxu0 %v1733_v1  ;;  %1437 = vmatpush3.bf16.msra.mxu0 %v1594_v27 }
  0x1c   :  { %1438 = vmatprep.subr.bf16.mxu0 %v1595_v28 }
  0x1d   :  { %1557 = vmatpush3.bf16.msra.mxu1 %v1600_v34 }
  0x1e   :  { %1550 = vmatprep.subr.bf16.mxu1 %v1601_v35 }
  0x1f   :  { %1439 = vmatpush3.bf16.msra.mxu0 %v1596_v29 }
  0x20   :  { %1440 = vmatprep.subr.bf16.mxu0 %v1597_v30 }
  0x21   :  { %1558 = vmatpush3.bf16.msra.mxu1 %v1602_v37 }
  0x22   :  { %1401 = vmatmul.mubr.msk.bf16.gmra.mrb[8].mxu0 %vm193_vm0, %v1575_v11  ;;  %1551 = vmatprep.subr.bf16.mxu1 %v1603_v38 }
  0x23   :  { %304 = vmatprep.mubr.bf16.mxu0 %v1733_v1  ;;  %1441 = vmatpush3.bf16.msra.mxu0 %v1598_v32 }
  0x24   :  { %1442 = vmatprep.subr.bf16.mxu0 %v1599_v33 }
  0x25   :  { %1559 = vmatpush3.bf16.msra.mxu1 %v1604_v39 }
  0x27   :  { %1443 = vmatpush3.bf16.msra.mxu0 %v1600_v34 }
  0x28   :  { %1444 = vmatprep.subr.bf16.mxu0 %v1601_v35 }
  0x2a   :  { %1402 = vmatmul.mubr.msk.bf16.gmra.mrb[12].mxu0 %vm193_vm0, %v1576_v12 }
  0x2b   :  { %314 = vmatprep.mubr.bf16.mxu0 %v1733_v1  ;;  %1445 = vmatpush3.bf16.msra.mxu0 %v1602_v37 }
  0x2c   :  { %1446 = vmatprep.subr.bf16.mxu0 %v1603_v38 }
  0x2f   :  { %1447 = vmatpush3.bf16.msra.mxu0 %v1604_v39 }
  0x32   :  { %1403 = vmatmul.mubr.msk.bf16.gmra.mrb[16].mxu0 %vm193_vm0, %v1577_v13 }
  0x33   :  { %324 = vmatprep.mubr.bf16.mxu0 %v1733_v1 }
  0x3a   :  { %1404 = vmatmul.mubr.msk.bf16.gmra.mrb[20].mxu0 %vm193_vm0, %v1578_v14 }
  0x3b   :  { %334 = vmatprep.mubr.bf16.mxu0 %v1733_v1 }
  0x42   :  { %1405 = vmatmul.mubr.msk.bf16.gmra.mrb[24].mxu0 %vm193_vm0, %v1579_v15 }
  0x43   :  { %344 = vmatprep.mubr.bf16.mxu0 %v1733_v1 }
  0x4a   :  { %1406 = vmatmul.mubr.msk.bf16.gmra.mrb[28].mxu0 %vm193_vm0, %v1580_v16 }
  0x4b   :  { %354 = vmatprep.mubr.bf16.mxu0 %v1733_v1 }
  0x52   :  { %1407 = vmatmul.mubr.msk.bf16.gmra.mrb[32].mxu0 %vm193_vm0, %v1581_v17 }
  0x53   :  { %364 = vmatprep.mubr.bf16.mxu0 %v1733_v1 }
  0x5a   :  { %1408 = vmatmul.mubr.msk.bf16.gmra.mrb[36].mxu0 %vm193_vm0, %v1582_v18 }
  0x5b   :  { %374 = vmatprep.mubr.bf16.mxu0 %v1733_v1 }
  0x62   :  { %1409 = vmatmul.mubr.msk.bf16.gmra.mrb[40].mxu0 %vm193_vm0, %v1583_v19 }
  0x63   :  { %384 = vmatprep.mubr.bf16.mxu0 %v1733_v1 }
  0x6a   :  { %1410 = vmatmul.mubr.msk.bf16.gmra.mrb[44].mxu0 %vm193_vm0, %v1584_v20 }
  0x6b   :  { %394 = vmatprep.mubr.bf16.mxu0 %v1733_v1 }
  0x72   :  { %1411 = vmatmul.mubr.msk.bf16.gmra.mrb[48].mxu0 %vm193_vm0, %v1585_v25 }
  0x73   :  { %404 = vmatprep.mubr.bf16.mxu0 %v1733_v1 }
  0x7a   :  { %1412 = vmatmul.mubr.msk.bf16.gmra.mrb[52].mxu0 %vm193_vm0, %v1586_v31 }
  0x7b   :  { %414 = vmatprep.mubr.bf16.mxu0 %v1733_v1 }
  0x82   :  { %1413 = vmatmul.mubr.msk.bf16.gmra.mrb[56].mxu0 %vm193_vm0, %v1587_v36 }
  0x83   :  { %424 = vmatprep.mubr.bf16.mxu0 %v1733_v1 }
  0x8a   :  { %1414 = vmatmul.mubr.msk.bf16.gmra.mrb[60].mxu0 %vm193_vm0, %v1588_v40 }
  0xe5   :  { %v276_v48 = vpop.f32.mrb[0].mxu0 }
  0xe6   :  { %v1924_v49 = vadd.f32 %v276_v48, %v1919_v46  ;;  %v278_v50 = vpop.f32.mrb[1].mxu0 }
  0xe7   :  { %v1927_v51 = vadd.f32 %v278_v50, %v1921_v47  ;;  %v280_v52 = vpop.f32.mrb[2].mxu0 }
  0xe8   :  { %v499_v53 = vmul.f32 0.044715, %v1924_v49  ;;  %v1931_v54 = vadd.f32 %v280_v52, %v1919_v46  ;;  %v282_v55 = vpop.f32.mrb[3].mxu0  ;;  %v435_v48 = vmul.f32 0.5, %v1924_v49 }
  0xe9   :  { %v500_v56 = vmul.f32 0.044715, %v1927_v51  ;;  %v1935_v57 = vadd.f32 %v282_v55, %v1921_v47  ;;  %v436_v50 = vmul.f32 0.5, %v1927_v51 }
  0xea   :  { %v563_v58 = vmul.f32 %v499_v53, %v1924_v49  ;;  %v501_v59 = vmul.f32 0.044715, %v1931_v54 }
  0xeb   :  { %v564_v60 = vmul.f32 %v500_v56, %v1927_v51  ;;  %v502_v61 = vmul.f32 0.044715, %v1935_v57 }
  0xec   :  { %v627_v62 = vmul.f32 %v563_v58, %v1924_v49  ;;  %v565_v63 = vmul.f32 %v501_v59, %v1931_v54 }
  0xed   :  { %v628_v0 = vmul.f32 %v564_v60, %v1927_v51  ;;  %v566_v1 = vmul.f32 %v502_v61, %v1935_v57  ;;  %v286_v2 = vpop.f32.mrb[4].mxu0  ;;  %v437_v60 = vmul.f32 0.5, %v1931_v54 }
  0xee   :  { %v691_v3 = vadd.f32 %v627_v62, %v1924_v49  ;;  %v629_v4 = vmul.f32 %v565_v63, %v1931_v54  ;;  %v1948_v5 = vadd.f32 %v286_v2, %v1919_v46  ;;  %v288_v6 = vpop.f32.mrb[5].mxu0  ;;  %v438_v62 = vmul.f32 0.5, %v1935_v57 }
  0xef   :  { %v630_v7 = vmul.f32 %v566_v1, %v1935_v57  ;;  %v1952_v8 = vadd.f32 %v288_v6, %v1921_v47  ;;  %v290_v9 = vpop.f32.mrb[6].mxu0  ;;  %v692_v10 = vadd.f32 %v628_v0, %v1927_v51 }
  0xf0   :  { %v755_v11 = vmul.f32 0.7978846, %v691_v3  ;;  %v693_v12 = vadd.f32 %v629_v4, %v1931_v54  ;;  %v503_v13 = vmul.f32 0.044715, %v1948_v5  ;;  %v1958_v14 = vadd.f32 %v290_v9, %v1919_v46  ;;  %v292_v15 = vpop.f32.mrb[7].mxu0 }
  0xf1   :  { %v504_v16 = vmul.f32 0.044715, %v1952_v8  ;;  %v1962_v17 = vadd.f32 %v292_v15, %v1921_v47  ;;  %v694_v18 = vadd.f32 %v630_v7, %v1935_v57  ;;  %v756_v19 = vmul.f32 0.7978846, %v692_v10 }
  0xf2   :  { %1605 = vtanh.f32 %v755_v11  ;;  %v757_v20 = vmul.f32 0.7978846, %v693_v12  ;;  %v567_v21 = vmul.f32 %v503_v13, %v1948_v5  ;;  %v505_v22 = vmul.f32 0.044715, %v1958_v14 }
  0xf3   :  { %v506_v23 = vmul.f32 0.044715, %v1962_v17  ;;  %v758_v24 = vmul.f32 0.7978846, %v694_v18  ;;  %1607 = vtanh.f32 %v756_v19  ;;  %v568_v28 = vmul.f32 %v504_v16, %v1952_v8 }
  0xf4   :  { %1609 = vtanh.f32 %v757_v20  ;;  %v631_v25 = vmul.f32 %v567_v21, %v1948_v5  ;;  %v569_v26 = vmul.f32 %v505_v22, %v1958_v14  ;;  %v2003_v54 = vmul.f32 0.5, %v1952_v8 }
  0xf5   :  { %v296_v27 = vpop.f32.mrb[8].mxu0  ;;  %1611 = vtanh.f32 %v758_v24  ;;  %v570_v29 = vmul.f32 %v506_v23, %v1962_v17  ;;  %v632_v35 = vmul.f32 %v568_v28, %v1952_v8  ;;  %v442_v18 = vmul.f32 0.5, %v1962_v17 }
  0xf6   :  { %v633_v30 = vmul.f32 %v569_v26, %v1958_v14  ;;  %v298_v31 = vpop.f32.mrb[9].mxu0  ;;  %v695_v32 = vadd.f32 %v631_v25, %v1948_v5  ;;  %v1980_v37 = vadd.f32 %v296_v27, %v1919_v46 }
  0xf7   :  { %v1975_v33 = vadd.f32 %v298_v31, %v1921_v47  ;;  %v300_v34 = vpop.f32.mrb[10].mxu0  ;;  %v634_v36 = vmul.f32 %v570_v29, %v1962_v17  ;;  %v696_v44 = vadd.f32 %v632_v35, %v1952_v8 }
  0xf8   :  { %v1983_v38 = vadd.f32 %v300_v34, %v1919_v46  ;;  %v302_v39 = vpop.f32.mrb[11].mxu0  ;;  %v697_v40 = vadd.f32 %v633_v30, %v1958_v14  ;;  %v759_v41 = vmul.f32 0.7978846, %v695_v32  ;;  %v507_v61 = vmul.f32 0.044715, %v1980_v37 }
  0xf9   :  { %v508_v42 = vmul.f32 0.044715, %v1975_v33  ;;  %v1988_v43 = vadd.f32 %v302_v39, %v1921_v47  ;;  %v698_v45 = vadd.f32 %v634_v36, %v1962_v17  ;;  %v760_v56 = vmul.f32 0.7978846, %v696_v44 }
  0xfa   :  { %v761_v52 = vmul.f32 0.7978846, %v697_v40  ;;  %1613 = vtanh.f32 %v759_v41  ;;  %v509_v49 = vmul.f32 0.044715, %v1983_v38  ;;  %v571_v13 = vmul.f32 %v507_v61, %v1980_v37 }
  0xfb   :  { %v572_v53 = vmul.f32 %v508_v42, %v1975_v33  ;;  %v510_v55 = vmul.f32 0.044715, %v1988_v43  ;;  %v762_v58 = vmul.f32 0.7978846, %v698_v45  ;;  %v439_v34 = vmul.f32 0.5, %v1948_v5 }
  0xfc   :  { %v1606_v59 = vpop.eup %1605  ;;  %1615 = vtanh.f32 %v761_v52  ;;  %v573_v19 = vmul.f32 %v509_v49, %v1983_v38  ;;  %v635_v36 = vmul.f32 %v571_v13, %v1980_v37  ;;  %v441_v40 = vmul.f32 0.5, %v1958_v14 }
  0xfd   :  { %v1608_v63 = vpop.eup %1607  ;;  %v574_v51 = vmul.f32 %v510_v55, %v1988_v43  ;;  %v306_v0 = vpop.f32.mrb[12].mxu0  ;;  %v883_v1 = vadd.f32 1.0, %v1606_v59  ;;  %1617 = vtanh.f32 %v760_v56  ;;  %v636_v3 = vmul.f32 %v572_v53, %v1975_v33 }
  0xfe   :  { %v1610_v2 = vpop.eup %1609  ;;  %v308_v4 = vpop.f32.mrb[13].mxu0  ;;  %v884_v6 = vadd.f32 1.0, %v1608_v63  ;;  %1619 = vtanh.f32 %v762_v58  ;;  %v2007_v9 = vadd.f32 %v306_v0, %v1919_v46  ;;  %v637_v45 = vmul.f32 %v573_v19, %v1983_v38 }
  0xff   :  { %v1612_v7 = vpop.eup %1611  ;;  %v638_v57 = vmul.f32 %v574_v51, %v1988_v43  ;;  %v2010_v10 = vadd.f32 %v308_v4, %v1921_v47  ;;  %v310_v11 = vpop.f32.mrb[14].mxu0  ;;  %v885_v12 = vadd.f32 1.0, %v1610_v2  ;;  %v947_v21 = vmul.f32 %v883_v1, %v435_v48 }
 0x100   :  { %v2014_v15 = vadd.f32 %v310_v11, %v1919_v46  ;;  %v312_v16 = vpop.f32.mrb[15].mxu0  ;;  %v886_v8 = vadd.f32 1.0, %v1612_v7  ;;  %v948_v24 = vmul.f32 %v884_v6, %v436_v50  ;;  %v700_v26 = vadd.f32 %v636_v3, %v1975_v33 }
 0x101   :  { %v2019_v20 = vadd.f32 %v312_v16, %v1921_v47  ;;  %v949_v22 = vmul.f32 %v885_v12, %v437_v60  ;;  %v512_v23 = vmul.f32 0.044715, %v2010_v10  ;;  %v511_v27 = vmul.f32 0.044715, %v2007_v9 }
 0x102   :  { %v950_v25 = vmul.f32 %v886_v8, %v438_v62  ;;  %v513_v28 = vmul.f32 0.044715, %v2014_v15  ;;  %v702_v17 = vadd.f32 %v638_v57, %v1988_v43  ;;  %v764_v35 = vmul.f32 0.7978846, %v700_v26 }
 0x103   :  { %v1011_v29 = vpack.c.bf16 %v949_v22, %v947_v21  ;;  %v514_v31 = vmul.f32 0.044715, %v2019_v20  ;;  %v576_v48 = vmul.f32 %v512_v23, %v2010_v10  ;;  %v575_v53 = vmul.f32 %v511_v27, %v2007_v9 }
 0x104   :  { %v1614_v30 = vpop.eup %1613  ;;  %v1012_v32 = vpack.c.bf16 %v950_v25, %v948_v24  ;;  %v766_v42 = vmul.f32 0.7978846, %v702_v17  ;;  %1621 = vtanh.f32 %v764_v35  ;;  %v577_v55 = vmul.f32 %v513_v28, %v2014_v15 }
 0x105   :  { %v316_v39 = vpop.f32.mrb[16].mxu0  ;;  %v887_v41 = vadd.f32 1.0, %v1614_v30  ;;  %v578_v60 = vmul.f32 %v514_v31, %v2019_v20  ;;  %v640_v2 = vmul.f32 %v576_v48, %v2010_v10  ;;  %v444_v4 = vmul.f32 0.5, %v1975_v33 }
 0x106   :  { %v1616_v44 = vpop.eup %1615  ;;  %v2033_v50 = vadd.f32 %v316_v39, %v1919_v46  ;;  %v318_v52 = vpop.f32.mrb[17].mxu0  ;;  %1210 = vmatprep.mubr.bf16.mxu0 %v1012_v32  ;;  %1623 = vtanh.f32 %v766_v42  ;;  %v446_v6 = vmul.f32 0.5, %v1988_v43  ;;  %v639_v13 = vmul.f32 %v575_v53, %v2007_v9 }
 0x107   :  { %v1618_v5 = vpop.eup %1617  ;;  %v2038_v14 = vadd.f32 %v318_v52, %v1921_v47  ;;  %v320_v56 = vpop.f32.mrb[18].mxu0  ;;  %1211 = vmatmul.mubr.bf16.vlgmr.msra.gmra.mrb[64].mxu0 %v1011_v29  ;;  %v889_v58 = vadd.f32 1.0, %v1616_v44  ;;  %v951_v63 = vmul.f32 %v887_v41, %v439_v34  ;;  %v642_v16 = vmul.f32 %v578_v60, %v2019_v20 }
 0x108   :  { %v1620_v59 = vpop.eup %1619  ;;  %v322_v61 = vpop.f32.mrb[19].mxu0  ;;  %v888_v62 = vadd.f32 1.0, %v1618_v5  ;;  %v2042_v49 = vadd.f32 %v320_v56, %v1919_v46  ;;  %v515_v3 = vmul.f32 0.044715, %v2033_v50  ;;  %v699_v8 = vadd.f32 %v635_v36, %v1980_v37 }
 0x109   :  { %v2045_v51 = vadd.f32 %v322_v61, %v1921_v47  ;;  %v890_v0 = vadd.f32 1.0, %v1620_v59  ;;  %v953_v1 = vmul.f32 %v889_v58, %v441_v40  ;;  %v516_v7 = vmul.f32 0.044715, %v2038_v14 }
 0x10a   :  { %v952_v57 = vmul.f32 %v888_v62, %v2003_v54  ;;  %v701_v19 = vadd.f32 %v637_v45, %v1983_v38  ;;  %v641_v21 = vmul.f32 %v577_v55, %v2014_v15  ;;  %v517_v33 = vmul.f32 0.044715, %v2042_v49 }
 0x10b   :  { %v954_v11 = vmul.f32 %v890_v0, %v442_v18  ;;  %v1013_v12 = vpack.c.bf16 %v953_v1, %v951_v63  ;;  %v518_v43 = vmul.f32 0.044715, %v2045_v51  ;;  %v2064_v24 = vmul.f32 0.5, %v1980_v37 }
 0x10c   :  { %v763_v25 = vmul.f32 0.7978846, %v699_v8  ;;  %v765_v26 = vmul.f32 0.7978846, %v701_v19  ;;  %v579_v27 = vmul.f32 %v515_v3, %v2033_v50  ;;  %v580_v28 = vmul.f32 %v516_v7, %v2038_v14 }
 0x10d   :  { %v326_v22 = vpop.f32.mrb[20].mxu0  ;;  %v1014_v23 = vpack.c.bf16 %v954_v11, %v952_v57  ;;  %v704_v30 = vadd.f32 %v640_v2, %v2010_v10  ;;  %v706_v35 = vadd.f32 %v642_v16, %v2019_v20  ;;  %v445_v40 = vmul.f32 0.5, %v1983_v38 }
 0x10e   :  { %v2061_v54 = vadd.f32 %v326_v22, %v1919_v46  ;;  %v328_v18 = vpop.f32.mrb[21].mxu0  ;;  %v1622_v31 = vpop.eup %1621  ;;  %1625 = vtanh.f32 %v763_v25  ;;  %v581_v42 = vmul.f32 %v517_v33, %v2042_v49  ;;  %v582_v44 = vmul.f32 %v518_v43, %v2045_v51 }
 0x10f   :  { %v2069_v29 = vadd.f32 %v328_v18, %v1921_v47  ;;  %1218 = vmatprep.mubr.bf16.mxu1 %v1014_v23  ;;  %v330_v17 = vpop.f32.mrb[22].mxu0  ;;  %v892_v39 = vadd.f32 1.0, %v1622_v31  ;;  %1627 = vtanh.f32 %v765_v26  ;;  %v768_v45 = vmul.f32 0.7978846, %v704_v30 }
 0x110   :  { %v519_v32 = vmul.f32 0.044715, %v2061_v54  ;;  %v2074_v34 = vadd.f32 %v330_v17, %v1919_v46  ;;  %1219 = vmatmul.mubr.bf16.vlgmr.msra.gmra.mrb[0].mxu1 %v1013_v12  ;;  %v332_v37 = vpop.f32.mrb[23].mxu0  ;;  %v1624_v41 = vpop.eup %1623  ;;  %v770_v48 = vmul.f32 0.7978846, %v706_v35  ;;  %v2084_v52 = vmul.f32 %v579_v27, %v2033_v50 }
 0x111   :  { %v2078_v36 = vadd.f32 %v332_v37, %v1921_v47  ;;  %v520_v5 = vmul.f32 0.044715, %v2069_v29  ;;  %v894_v55 = vadd.f32 1.0, %v1624_v41  ;;  %v644_v56 = vmul.f32 %v580_v28, %v2038_v14 }
 0x112   :  { %v521_v53 = vmul.f32 0.044715, %v2074_v34  ;;  %v583_v38 = vmul.f32 %v519_v32, %v2061_v54  ;;  %v2091_v58 = vmul.f32 0.5, %v2010_v10  ;;  %1629 = vtanh.f32 %v768_v45 }
 0x113   :  { %v522_v59 = vmul.f32 0.044715, %v2078_v36  ;;  %v956_v61 = vmul.f32 %v892_v39, %v444_v4  ;;  %v958_v62 = vmul.f32 %v894_v55, %v446_v6  ;;  %1631 = vtanh.f32 %v770_v48 }
 0x114   :  { %v2095_v63 = vmul.f32 %v581_v42, %v2042_v49  ;;  %v646_v0 = vmul.f32 %v582_v44, %v2045_v51  ;;  %v703_v3 = vadd.f32 %v639_v13, %v2007_v9  ;;  %v584_v10 = vmul.f32 %v520_v5, %v2069_v29 }
 0x115   :  { %v336_v60 = vpop.f32.mrb[24].mxu0  ;;  %v585_v7 = vmul.f32 %v521_v53, %v2074_v34  ;;  %v1016_v57 = vpack.c.bf16 %v958_v62, %v956_v61  ;;  %v705_v4 = vadd.f32 %v641_v21, %v2014_v15  ;;  %v2106_v6 = vmul.f32 %v583_v38, %v2061_v54 }
 0x116   :  { %v2099_v1 = vadd.f32 %v336_v60, %v1919_v46  ;;  %v338_v2 = vpop.f32.mrb[25].mxu0  ;;  %v450_v8 = vmul.f32 0.5, %v2019_v20  ;;  %v767_v19 = vmul.f32 0.7978846, %v703_v3  ;;  %v586_v13 = vmul.f32 %v522_v59, %v2078_v36 }
 0x117   :  { %v340_v11 = vpop.f32.mrb[26].mxu0  ;;  %v2109_v12 = vadd.f32 %v338_v2, %v1921_v47  ;;  %1226 = vmatprep.mubr.bf16.mxu1 %v1016_v57  ;;  %v769_v22 = vmul.f32 0.7978846, %v705_v4  ;;  %v2121_v18 = vmul.f32 0.5, %v2007_v9  ;;  %v708_v20 = vadd.f32 %v644_v56, %v2038_v14 }
 0x118   :  { %v342_v16 = vpop.f32.mrb[27].mxu0  ;;  %v523_v33 = vmul.f32 0.044715, %v2099_v1  ;;  %v2115_v43 = vadd.f32 %v340_v11, %v1919_v46  ;;  %v1626_v21 = vpop.eup %1625  ;;  %1633 = vtanh.f32 %v767_v19  ;;  %v2125_v26 = vmul.f32 %v584_v10, %v2069_v29 }
 0x119   :  { %v2118_v23 = vadd.f32 %v342_v16, %v1921_v47  ;;  %v1628_v25 = vpop.eup %1627  ;;  %v2128_v27 = vmul.f32 %v585_v7, %v2074_v34  ;;  %v891_v28 = vadd.f32 1.0, %v1626_v21  ;;  %1635 = vtanh.f32 %v769_v22 }
 0x11a   :  { %v524_v17 = vmul.f32 0.044715, %v2109_v12  ;;  %v893_v30 = vadd.f32 1.0, %v1628_v25  ;;  %v449_v31 = vmul.f32 0.5, %v2014_v15  ;;  %v710_v9 = vadd.f32 %v646_v0, %v2045_v51 }
 0x11b   :  { %v2134_v32 = vmul.f32 %v586_v13, %v2078_v36  ;;  %v587_v37 = vmul.f32 %v523_v33, %v2099_v1  ;;  %v525_v35 = vmul.f32 0.044715, %v2115_v43  ;;  %v772_v41 = vmul.f32 0.7978846, %v708_v20 }
 0x11c   :  { %v1630_v42 = vpop.eup %1629  ;;  %v955_v44 = vmul.f32 %v891_v28, %v2064_v24  ;;  %v957_v45 = vmul.f32 %v893_v30, %v445_v40  ;;  %v526_v48 = vmul.f32 0.044715, %v2118_v23  ;;  %v774_v53 = vmul.f32 0.7978846, %v710_v9 }
 0x11d   :  { %v346_v39 = vpop.f32.mrb[28].mxu0  ;;  %v1632_v15 = vpop.eup %1631  ;;  %v896_v38 = vadd.f32 1.0, %v1630_v42  ;;  %1637 = vtanh.f32 %v772_v41  ;;  %v588_v60 = vmul.f32 %v524_v17, %v2109_v12  ;;  %v589_v0 = vmul.f32 %v525_v35, %v2115_v43 }
 0x11e   :  { %v348_v5 = vpop.f32.mrb[29].mxu0  ;;  %v2141_v55 = vadd.f32 %v346_v39, %v1919_v46  ;;  %v1015_v61 = vpack.c.bf16 %v957_v45, %v955_v44  ;;  %v898_v62 = vadd.f32 1.0, %v1632_v15  ;;  %v2155_v3 = vmul.f32 0.5, %v2038_v14 }
 0x11f   :  { %v2144_v56 = vadd.f32 %v348_v5, %v1921_v47  ;;  %v350_v59 = vpop.f32.mrb[30].mxu0  ;;  %1639 = vtanh.f32 %v774_v53  ;;  %v590_v10 = vmul.f32 %v526_v48, %v2118_v23  ;;  %v960_v7 = vmul.f32 %v896_v38, %v2091_v58 }
 0x120   :  { %v2148_v24 = vadd.f32 %v350_v59, %v1919_v46  ;;  %v352_v40 = vpop.f32.mrb[31].mxu0  ;;  %1227 = vmatmul.mubr.bf16.gmra.mrb[4].mxu1 %v1015_v61  ;;  %v962_v57 = vmul.f32 %v898_v62, %v450_v8  ;;  %v454_v11 = vmul.f32 0.5, %v2045_v51  ;;  %v2161_v4 = vmul.f32 %v587_v37, %v2099_v1 }
 0x121   :  { %v2152_v2 = vadd.f32 %v352_v40, %v1921_v47  ;;  %v527_v16 = vmul.f32 0.044715, %v2141_v55  ;;  %v528_v19 = vmul.f32 0.044715, %v2144_v56  ;;  %v707_v14 = vadd.f32 %v2084_v52, %v2033_v50 }
 0x122   :  { %v1634_v13 = vpop.eup %1633  ;;  %v2168_v33 = vmul.f32 %v588_v60, %v2109_v12  ;;  %v1018_v22 = vpack.c.bf16 %v962_v57, %v960_v7  ;;  %v529_v58 = vmul.f32 0.044715, %v2148_v24  ;;  %v709_v51 = vadd.f32 %v2095_v63, %v2042_v49 }
 0x123   :  { %v1636_v8 = vpop.eup %1635  ;;  %v2174_v21 = vmul.f32 %v589_v0, %v2115_v43  ;;  %v895_v20 = vadd.f32 1.0, %v1634_v13  ;;  %v530_v25 = vmul.f32 0.044715, %v2152_v2  ;;  %v771_v17 = vmul.f32 0.7978846, %v707_v14 }
 0x124   :  { %v2178_v52 = vmul.f32 %v590_v10, %v2118_v23  ;;  %1234 = vmatprep.mubr.bf16.mxu1 %v1018_v22  ;;  %v897_v30 = vadd.f32 1.0, %v1636_v8  ;;  %v773_v35 = vmul.f32 0.7978846, %v709_v51  ;;  %v591_v63 = vmul.f32 %v527_v16, %v2141_v55 }
 0x125   :  { %v356_v28 = vpop.f32.mrb[32].mxu0  ;;  %v592_v39 = vmul.f32 %v528_v19, %v2144_v56  ;;  %1641 = vtanh.f32 %v771_v17  ;;  %v959_v44 = vmul.f32 %v895_v20, %v2121_v18  ;;  %v593_v15 = vmul.f32 %v529_v58, %v2148_v24 }
 0x126   :  { %v2181_v9 = vadd.f32 %v356_v28, %v1919_v46  ;;  %v358_v37 = vpop.f32.mrb[33].mxu0  ;;  %v961_v45 = vmul.f32 %v897_v30, %v449_v31  ;;  %1643 = vtanh.f32 %v773_v35  ;;  %v594_v38 = vmul.f32 %v530_v25, %v2152_v2 }
 0x127   :  { %v2186_v41 = vadd.f32 %v358_v37, %v1921_v47  ;;  %v360_v42 = vpop.f32.mrb[34].mxu0  ;;  %v1638_v53 = vpop.eup %1637  ;;  %v451_v59 = vmul.f32 0.5, %v2033_v50  ;;  %v712_v7 = vadd.f32 %v2125_v26, %v2069_v29  ;;  %v714_v50 = vadd.f32 %v2134_v32, %v2078_v36 }
 0x128   :  { %v2190_v48 = vadd.f32 %v360_v42, %v1919_v46  ;;  %v362_v5 = vpop.f32.mrb[35].mxu0  ;;  %v1017_v61 = vpack.c.bf16 %v961_v45, %v959_v44  ;;  %v531_v62 = vmul.f32 0.044715, %v2181_v9  ;;  %v900_v31 = vadd.f32 1.0, %v1638_v53 }
 0x129   :  { %v2196_v60 = vadd.f32 %v362_v5, %v1921_v47  ;;  %v532_v18 = vmul.f32 0.044715, %v2186_v41  ;;  %v1640_v40 = vpop.eup %1639  ;;  %v2207_v57 = vmul.f32 %v591_v63, %v2141_v55  ;;  %v2210_v16 = vmul.f32 %v592_v39, %v2144_v56 }
 0x12a   :  { %v533_v0 = vmul.f32 0.044715, %v2190_v48  ;;  %1235 = vmatmul.mubr.bf16.gmra.mrb[8].mxu1 %v1017_v61  ;;  %v902_v19 = vadd.f32 1.0, %v1640_v40  ;;  %v453_v14 = vmul.f32 0.5, %v2042_v49  ;;  %v2214_v13 = vmul.f32 %v593_v15, %v2148_v24 }
 0x12b   :  { %v534_v10 = vmul.f32 0.044715, %v2196_v60  ;;  %v2217_v22 = vmul.f32 %v594_v38, %v2152_v2  ;;  %v776_v58 = vmul.f32 0.7978846, %v712_v7  ;;  %v778_v51 = vmul.f32 0.7978846, %v714_v50 }
 0x12c   :  { %v595_v32 = vmul.f32 %v531_v62, %v2181_v9  ;;  %v596_v8 = vmul.f32 %v532_v18, %v2186_v41  ;;  %v964_v20 = vmul.f32 %v900_v31, %v2155_v3  ;;  %v966_v25 = vmul.f32 %v902_v19, %v454_v11 }
 0x12d   :  { %v366_v26 = vpop.f32.mrb[36].mxu0  ;;  %v597_v17 = vmul.f32 %v533_v0, %v2190_v48  ;;  %v598_v49 = vmul.f32 %v534_v10, %v2196_v60  ;;  %v2225_v30 = vmul.f32 0.5, %v2069_v29  ;;  %1645 = vtanh.f32 %v776_v58 }
 0x12e   :  { %v368_v28 = vpop.f32.mrb[37].mxu0  ;;  %v1020_v35 = vpack.c.bf16 %v966_v25, %v964_v20  ;;  %v2228_v63 = vadd.f32 %v366_v26, %v1919_v46  ;;  %1647 = vtanh.f32 %v778_v51  ;;  %v458_v42 = vmul.f32 0.5, %v2078_v36 }
 0x12f   :  { %v370_v37 = vpop.f32.mrb[38].mxu0  ;;  %v2231_v39 = vadd.f32 %v368_v28, %v1921_v47  ;;  %v1642_v11 = vpop.eup %1641  ;;  %v711_v29 = vadd.f32 %v2106_v6, %v2061_v54  ;;  %v713_v45 = vadd.f32 %v2128_v27, %v2074_v34  ;;  %v2242_v53 = vmul.f32 %v595_v32, %v2181_v9 }
 0x130   :  { %v372_v3 = vpop.f32.mrb[39].mxu0  ;;  %v2235_v44 = vadd.f32 %v370_v37, %v1919_v46  ;;  %v1644_v5 = vpop.eup %1643  ;;  %v2245_v15 = vmul.f32 %v596_v8, %v2186_v41  ;;  %1242 = vmatprep.mubr.bf16.mxu1 %v1020_v35  ;;  %v899_v38 = vadd.f32 1.0, %v1642_v11  ;;  %v2251_v61 = vmul.f32 %v597_v17, %v2190_v48 }
 0x131   :  { %v2248_v36 = vadd.f32 %v372_v3, %v1921_v47  ;;  %v901_v62 = vadd.f32 1.0, %v1644_v5  ;;  %v775_v6 = vmul.f32 0.7978846, %v711_v29  ;;  %v777_v18 = vmul.f32 0.7978846, %v713_v45 }
 0x132   :  { %v2254_v27 = vmul.f32 %v598_v49, %v2196_v60  ;;  %v535_v31 = vmul.f32 0.044715, %v2228_v63  ;;  %v536_v40 = vmul.f32 0.044715, %v2231_v39  ;;  %v2259_v0 = vmul.f32 0.5, %v2061_v54 }
 0x133   :  { %v963_v10 = vmul.f32 %v899_v38, %v451_v59  ;;  %v965_v7 = vmul.f32 %v901_v62, %v453_v14  ;;  %v537_v50 = vmul.f32 0.044715, %v2235_v44  ;;  %1649 = vtanh.f32 %v775_v6 }
 0x134   :  { %v2263_v26 = vmul.f32 0.5, %v2074_v34  ;;  %1651 = vtanh.f32 %v777_v18  ;;  %v538_v58 = vmul.f32 0.044715, %v2248_v36  ;;  %v716_v59 = vadd.f32 %v2168_v33, %v2109_v12 }
 0x135   :  { %v376_v19 = vpop.f32.mrb[40].mxu0  ;;  %v1019_v8 = vpack.c.bf16 %v965_v7, %v963_v10  ;;  %v718_v14 = vadd.f32 %v2178_v52, %v2118_v23  ;;  %v599_v34 = vmul.f32 %v535_v31, %v2228_v63  ;;  %v600_v25 = vmul.f32 %v536_v40, %v2231_v39 }
 0x136   :  { %v2267_v51 = vadd.f32 %v376_v19, %v1919_v46  ;;  %v378_v32 = vpop.f32.mrb[41].mxu0  ;;  %v2279_v28 = vmul.f32 0.5, %v2109_v12  ;;  %v601_v35 = vmul.f32 %v537_v50, %v2235_v44  ;;  %v780_v33 = vmul.f32 0.7978846, %v716_v59 }
 0x137   :  { %v2270_v54 = vadd.f32 %v378_v32, %v1921_v47  ;;  %v380_v20 = vpop.f32.mrb[42].mxu0  ;;  %v1646_v37 = vpop.eup %1645  ;;  %1243 = vmatmul.mubr.bf16.gmra.mrb[12].mxu1 %v1019_v8  ;;  %v782_v3 = vmul.f32 0.7978846, %v718_v14  ;;  %v715_v52 = vadd.f32 %v2161_v4, %v2099_v1  ;;  %v602_v45 = vmul.f32 %v538_v58, %v2248_v36 }
 0x138   :  { %v2282_v17 = vadd.f32 %v380_v20, %v1919_v46  ;;  %v382_v49 = vpop.f32.mrb[43].mxu0  ;;  %v1648_v11 = vpop.eup %1647  ;;  %v904_v29 = vadd.f32 1.0, %v1646_v37  ;;  %v539_v12 = vmul.f32 0.044715, %v2267_v51  ;;  %1653 = vtanh.f32 %v780_v33 }
 0x139   :  { %v540_v5 = vmul.f32 0.044715, %v2270_v54  ;;  %v906_v38 = vadd.f32 1.0, %v1648_v11  ;;  %v717_v6 = vadd.f32 %v2174_v21, %v2115_v43  ;;  %v2294_v18 = vmul.f32 %v599_v34, %v2228_v63 }
 0x13a   :  { %v541_v62 = vmul.f32 0.044715, %v2282_v17  ;;  %v2297_v4 = vmul.f32 %v600_v25, %v2231_v39  ;;  %v2300_v31 = vmul.f32 0.5, %v2118_v23  ;;  %1655 = vtanh.f32 %v782_v3 }
 0x13b   :  { %v968_v40 = vmul.f32 %v904_v29, %v2225_v30  ;;  %v970_v10 = vmul.f32 %v906_v38, %v458_v42  ;;  %v779_v7 = vmul.f32 0.7978846, %v715_v52  ;;  %v781_v50 = vmul.f32 0.7978846, %v717_v6 }
 0x13c   :  { %v2304_v58 = vmul.f32 %v601_v35, %v2235_v44  ;;  %v2307_v21 = vmul.f32 %v602_v45, %v2248_v36  ;;  %v603_v32 = vmul.f32 %v539_v12, %v2267_v51  ;;  %v2311_v8 = vadd.f32 %v382_v49, %v1921_v47 }
 0x13d   :  { %v386_v19 = vpop.f32.mrb[44].mxu0  ;;  %v1650_v59 = vpop.eup %1649  ;;  %v1022_v14 = vpack.c.bf16 %v970_v10, %v968_v40  ;;  %v604_v30 = vmul.f32 %v540_v5, %v2270_v54  ;;  %v605_v42 = vmul.f32 %v541_v62, %v2282_v17  ;;  %1657 = vtanh.f32 %v779_v7 }
 0x13e   :  { %v388_v23 = vpop.f32.mrb[45].mxu0  ;;  %v1652_v34 = vpop.eup %1651  ;;  %v903_v25 = vadd.f32 1.0, %v1650_v59  ;;  %1659 = vtanh.f32 %v781_v50  ;;  %v2316_v37 = vadd.f32 %v386_v19, %v1919_v46  ;;  %v542_v3 = vmul.f32 0.044715, %v2311_v8 }
 0x13f   :  { %v390_v20 = vpop.f32.mrb[46].mxu0  ;;  %v2319_v35 = vadd.f32 %v388_v23, %v1921_v47  ;;  %1250 = vmatprep.mubr.bf16.mxu1 %v1022_v14  ;;  %v905_v33 = vadd.f32 1.0, %v1652_v34  ;;  %v720_v52 = vadd.f32 %v2210_v16, %v2144_v56  ;;  %v722_v11 = vadd.f32 %v2217_v22, %v2152_v2 }
 0x140   :  { %v392_v49 = vpop.f32.mrb[47].mxu0  ;;  %v2327_v29 = vmul.f32 %v603_v32, %v2267_v51  ;;  %v459_v45 = vmul.f32 0.5, %v2099_v1  ;;  %v461_v12 = vmul.f32 0.5, %v2115_v43  ;;  %v2332_v5 = vadd.f32 %v390_v20, %v1919_v46 }
 0x141   :  { %v967_v38 = vmul.f32 %v903_v25, %v2259_v0  ;;  %v969_v62 = vmul.f32 %v905_v33, %v2263_v26  ;;  %v784_v6 = vmul.f32 0.7978846, %v720_v52  ;;  %v786_v40 = vmul.f32 0.7978846, %v722_v11 }
 0x142   :  { %v2337_v16 = vmul.f32 %v604_v30, %v2270_v54  ;;  %v2340_v22 = vmul.f32 %v605_v42, %v2282_v17  ;;  %v543_v10 = vmul.f32 0.044715, %v2316_v37  ;;  %v544_v1 = vmul.f32 0.044715, %v2319_v35  ;;  %v1654_v43 = vpop.eup %1653 }
 0x143   :  { %v1021_v7 = vpack.c.bf16 %v969_v62, %v967_v38  ;;  %v606_v50 = vmul.f32 %v542_v3, %v2311_v8  ;;  %v2346_v0 = vmul.f32 0.5, %v2144_v56  ;;  %1661 = vtanh.f32 %v784_v6 }
 0x144   :  { %v1656_v19 = vpop.eup %1655  ;;  %v908_v32 = vadd.f32 1.0, %v1654_v43  ;;  %1663 = vtanh.f32 %v786_v40  ;;  %v545_v23 = vmul.f32 0.044715, %v2332_v5  ;;  %v719_v59 = vadd.f32 %v2207_v57, %v2141_v55 }
 0x145   :  { %v396_v26 = vpop.f32.mrb[48].mxu0  ;;  %1251 = vmatmul.mubr.bf16.gmra.mrb[16].mxu1 %v1021_v7  ;;  %v910_v30 = vadd.f32 1.0, %v1656_v19  ;;  %v466_v42 = vmul.f32 0.5, %v2152_v2  ;;  %v721_v20 = vadd.f32 %v2214_v13, %v2148_v24  ;;  %v2355_v56 = vadd.f32 %v392_v49, %v1921_v47 }
 0x146   :  { %v398_v14 = vpop.f32.mrb[49].mxu0  ;;  %v607_v25 = vmul.f32 %v543_v10, %v2316_v37  ;;  %v608_v33 = vmul.f32 %v544_v1, %v2319_v35  ;;  %v783_v3 = vmul.f32 0.7978846, %v719_v59  ;;  %v2360_v52 = vadd.f32 %v396_v26, %v1919_v46 }
 0x147   :  { %v400_v34 = vpop.f32.mrb[50].mxu0  ;;  %v1658_v11 = vpop.eup %1657  ;;  %v972_v38 = vmul.f32 %v908_v32, %v2279_v28  ;;  %v974_v2 = vmul.f32 %v910_v30, %v2300_v31  ;;  %v2365_v13 = vmul.f32 %v606_v50, %v2311_v8  ;;  %v785_v49 = vmul.f32 0.7978846, %v721_v20 }
 0x148   :  { %v402_v57 = vpop.f32.mrb[51].mxu0  ;;  %v1660_v62 = vpop.eup %1659  ;;  %v907_v6 = vadd.f32 1.0, %v1658_v11  ;;  %v609_v40 = vmul.f32 %v545_v23, %v2332_v5  ;;  %1665 = vtanh.f32 %v783_v3  ;;  %v2369_v10 = vadd.f32 %v398_v14, %v1921_v47 }
 0x149   :  { %v1024_v1 = vpack.c.bf16 %v974_v2, %v972_v38  ;;  %v909_v43 = vadd.f32 1.0, %v1660_v62  ;;  %1667 = vtanh.f32 %v785_v49  ;;  %v546_v7 = vmul.f32 0.044715, %v2355_v56 }
 0x14a   :  { %v2373_v28 = vmul.f32 %v607_v25, %v2316_v37  ;;  %v2376_v31 = vmul.f32 %v608_v33, %v2319_v35  ;;  %v463_v50 = vmul.f32 0.5, %v2141_v55  ;;  %v547_v26 = vmul.f32 0.044715, %v2360_v52 }
 0x14b   :  { %1258 = vmatprep.mubr.bf16.mxu1 %v1024_v1  ;;  %v971_v19 = vmul.f32 %v907_v6, %v459_v45  ;;  %v973_v32 = vmul.f32 %v909_v43, %v461_v12  ;;  %v724_v23 = vadd.f32 %v2245_v15, %v2186_v41  ;;  %v726_v59 = vadd.f32 %v2254_v27, %v2196_v60 }
 0x14c   :  { %v2385_v30 = vmul.f32 %v609_v40, %v2332_v5  ;;  %v465_v20 = vmul.f32 0.5, %v2148_v24  ;;  %v548_v25 = vmul.f32 0.044715, %v2369_v10  ;;  %v2390_v55 = vadd.f32 %v400_v34, %v1919_v46 }
 0x14d   :  { %v406_v14 = vpop.f32.mrb[52].mxu0  ;;  %v1662_v45 = vpop.eup %1661  ;;  %v1023_v12 = vpack.c.bf16 %v973_v32, %v971_v19  ;;  %v610_v3 = vmul.f32 %v546_v7, %v2355_v56  ;;  %v788_v15 = vmul.f32 0.7978846, %v724_v23  ;;  %v790_v11 = vmul.f32 0.7978846, %v726_v59 }
 0x14e   :  { %v408_v33 = vpop.f32.mrb[53].mxu0  ;;  %v1664_v27 = vpop.eup %1663  ;;  %v912_v2 = vadd.f32 1.0, %v1662_v45  ;;  %v549_v49 = vmul.f32 0.044715, %v2390_v55  ;;  %v723_v24 = vadd.f32 %v2242_v53, %v2181_v9  ;;  %v725_v62 = vadd.f32 %v2251_v61, %v2190_v48 }
 0x14f   :  { %v410_v38 = vpop.f32.mrb[54].mxu0  ;;  %1259 = vmatmul.mubr.bf16.gmra.mrb[20].mxu1 %v1023_v12  ;;  %v914_v6 = vadd.f32 1.0, %v1664_v27  ;;  %v611_v40 = vmul.f32 %v547_v26, %v2360_v52  ;;  %v2400_v1 = vmul.f32 0.5, %v2186_v41  ;;  %1669 = vtanh.f32 %v788_v15 }
 0x150   :  { %v412_v34 = vpop.f32.mrb[55].mxu0  ;;  %v612_v43 = vmul.f32 %v548_v25, %v2369_v10  ;;  %v2404_v7 = vmul.f32 0.5, %v2196_v60  ;;  %1671 = vtanh.f32 %v790_v11  ;;  %v787_v19 = vmul.f32 0.7978846, %v723_v24 }
 0x151   :  { %v976_v53 = vmul.f32 %v912_v2, %v2346_v0  ;;  %v978_v32 = vmul.f32 %v914_v6, %v466_v42  ;;  %v789_v61 = vmul.f32 0.7978846, %v725_v62  ;;  %v2408_v23 = vadd.f32 %v402_v57, %v1921_v47 }
 0x152   :  { %v1666_v59 = vpop.eup %1665  ;;  %v2411_v26 = vmul.f32 %v610_v3, %v2355_v56  ;;  %v613_v41 = vmul.f32 %v549_v49, %v2390_v55  ;;  %1673 = vtanh.f32 %v787_v19  ;;  %v2415_v25 = vadd.f32 %v406_v14, %v1919_v46 }
 0x153   :  { %v1668_v60 = vpop.eup %1667  ;;  %v1026_v45 = vpack.c.bf16 %v978_v32, %v976_v53  ;;  %v911_v12 = vadd.f32 1.0, %v1666_v59  ;;  %1675 = vtanh.f32 %v789_v61  ;;  %v2418_v0 = vadd.f32 %v408_v33, %v1921_v47 }
 0x154   :  { %v913_v57 = vadd.f32 1.0, %v1668_v60  ;;  %v2421_v15 = vmul.f32 %v611_v40, %v2360_v52  ;;  %v2424_v3 = vmul.f32 %v612_v43, %v2369_v10  ;;  %v467_v11 = vmul.f32 0.5, %v2181_v9 }
 0x155   :  { %v416_v42 = vpop.f32.mrb[56].mxu0  ;;  %1266 = vmatprep.mubr.bf16.mxu1 %v1026_v45  ;;  %v469_v14 = vmul.f32 0.5, %v2190_v48  ;;  %v550_v2 = vmul.f32 0.044715, %v2408_v23  ;;  %v728_v33 = vadd.f32 %v2297_v4, %v2231_v39  ;;  %v730_v49 = vadd.f32 %v2307_v21, %v2248_v36 }
 0x156   :  { %v418_v27 = vpop.f32.mrb[57].mxu0  ;;  %v975_v62 = vmul.f32 %v911_v12, %v463_v50  ;;  %v977_v6 = vmul.f32 %v913_v57, %v465_v20  ;;  %v551_v40 = vmul.f32 0.044715, %v2415_v25  ;;  %v2435_v43 = vadd.f32 %v410_v38, %v1919_v46 }
 0x157   :  { %v420_v24 = vpop.f32.mrb[58].mxu0  ;;  %v2440_v48 = vmul.f32 %v613_v41, %v2390_v55  ;;  %v552_v19 = vmul.f32 0.044715, %v2418_v0  ;;  %v792_v53 = vmul.f32 0.7978846, %v728_v33  ;;  %v2444_v21 = vmul.f32 0.5, %v2231_v39 }
 0x158   :  { %v2437_v9 = vpop.f32.mrb[59].mxu0  ;;  %v794_v4 = vmul.f32 0.7978846, %v730_v49  ;;  %v1025_v32 = vpack.c.bf16 %v977_v6, %v975_v62  ;;  %v553_v50 = vmul.f32 0.044715, %v2435_v43  ;;  %v727_v20 = vadd.f32 %v2294_v18, %v2228_v63 }
 0x159   :  { %v1670_v38 = vpop.eup %1669  ;;  %v614_v61 = vmul.f32 %v550_v2, %v2408_v23  ;;  %1677 = vtanh.f32 %v792_v53  ;;  %v729_v59 = vadd.f32 %v2304_v58, %v2235_v44  ;;  %v2453_v41 = vadd.f32 %v412_v34, %v1921_v47 }
 0x15a   :  { %v1672_v60 = vpop.eup %1671  ;;  %1267 = vmatmul.mubr.bf16.gmra.mrb[24].mxu1 %v1025_v32  ;;  %v916_v45 = vadd.f32 1.0, %v1670_v38  ;;  %v615_v39 = vmul.f32 %v551_v40, %v2415_v25  ;;  %1679 = vtanh.f32 %v794_v4  ;;  %v791_v12 = vmul.f32 0.7978846, %v727_v20 }
 0x15b   :  { %v918_v57 = vadd.f32 1.0, %v1672_v60  ;;  %v616_v18 = vmul.f32 %v552_v19, %v2418_v0  ;;  %v793_v33 = vmul.f32 0.7978846, %v729_v59  ;;  %v2458_v2 = vadd.f32 %v416_v42, %v1919_v46 }
 0x15c   :  { %v1674_v62 = vpop.eup %1673  ;;  %v617_v58 = vmul.f32 %v553_v50, %v2435_v43  ;;  %1681 = vtanh.f32 %v791_v12  ;;  %v554_v34 = vmul.f32 0.044715, %v2453_v41  ;;  %v2463_v6 = vadd.f32 %v418_v27, %v1921_v47 }
 0x15d   :  { %v426_v49 = vpop.f32.mrb[60].mxu0  ;;  %v1676_v53 = vpop.eup %1675  ;;  %v980_v4 = vmul.f32 %v916_v45, %v2400_v1  ;;  %v982_v19 = vmul.f32 %v918_v57, %v2404_v7  ;;  %v915_v32 = vadd.f32 1.0, %v1674_v62  ;;  %1683 = vtanh.f32 %v793_v33 }
 0x15e   :  { %v428_v40 = vpop.f32.mrb[61].mxu0  ;;  %v917_v20 = vadd.f32 1.0, %v1676_v53  ;;  %v2470_v38 = vmul.f32 %v614_v61, %v2408_v23  ;;  %v2473_v50 = vmul.f32 %v615_v39, %v2415_v25  ;;  %v474_v27 = vmul.f32 0.5, %v2248_v36 }
 0x15f   :  { %v2467_v42 = vpop.f32.mrb[62].mxu0  ;;  %v1028_v60 = vpack.c.bf16 %v982_v19, %v980_v4  ;;  %v471_v1 = vmul.f32 0.5, %v2228_v63  ;;  %v473_v7 = vmul.f32 0.5, %v2235_v44  ;;  %v555_v45 = vmul.f32 0.044715, %v2458_v2 }
 0x160   :  { %v2476_v59 = vpop.f32.mrb[63].mxu0  ;;  %v979_v12 = vmul.f32 %v915_v32, %v467_v11  ;;  %v981_v57 = vmul.f32 %v917_v20, %v469_v14  ;;  %v2482_v33 = vmul.f32 %v616_v18, %v2418_v0  ;;  %v732_v61 = vadd.f32 %v2337_v16, %v2270_v54 }
 0x161   :  { %1274 = vmatprep.mubr.bf16.mxu1 %v1028_v60  ;;  %v2487_v36 = vmul.f32 %v617_v58, %v2435_v43  ;;  %v618_v39 = vmul.f32 %v554_v34, %v2453_v41  ;;  %v556_v63 = vmul.f32 0.044715, %v2463_v6  ;;  %v734_v44 = vadd.f32 %v2365_v13, %v2311_v8 }
 0x162   :  { %v1027_v62 = vpack.c.bf16 %v981_v57, %v979_v12  ;;  %v796_v11 = vmul.f32 0.7978846, %v732_v61  ;;  %v2494_v14 = vadd.f32 %v420_v24, %v1919_v46  ;;  %v731_v18 = vadd.f32 %v2327_v29, %v2267_v51 }
 0x163   :  { %v1678_v16 = vpop.eup %1677  ;;  %v619_v53 = vmul.f32 %v555_v45, %v2458_v2  ;;  %v798_v58 = vmul.f32 0.7978846, %v734_v44  ;;  %v733_v34 = vadd.f32 %v2340_v22, %v2282_v17  ;;  %v2503_v4 = vadd.f32 %v2437_v9, %v1921_v47 }
 0x164   :  { %v1680_v13 = vpop.eup %1679  ;;  %1275 = vmatmul.mubr.bf16.gmra.mrb[28].mxu1 %v1027_v62  ;;  %v920_v19 = vadd.f32 1.0, %v1678_v16  ;;  %1685 = vtanh.f32 %v796_v11  ;;  %v795_v24 = vmul.f32 0.7978846, %v731_v18  ;;  %v2506_v32 = vadd.f32 %v426_v49, %v1919_v46 }
 0x165   :  { %v922_v29 = vadd.f32 1.0, %v1680_v13  ;;  %v476_v20 = vmul.f32 0.5, %v2270_v54  ;;  %1687 = vtanh.f32 %v798_v58  ;;  %v797_v60 = vmul.f32 0.7978846, %v733_v34 }
 0x166   :  { %v1682_v45 = vpop.eup %1681  ;;  %v984_v22 = vmul.f32 %v920_v19, %v2444_v21  ;;  %v620_v12 = vmul.f32 %v556_v63, %v2463_v6  ;;  %v557_v9 = vmul.f32 0.044715, %v2494_v14  ;;  %1689 = vtanh.f32 %v795_v24 }
 0x167   :  { %v1684_v57 = vpop.eup %1683  ;;  %v986_v61 = vmul.f32 %v922_v29, %v474_v27  ;;  %v919_v44 = vadd.f32 1.0, %v1682_v45  ;;  %1691 = vtanh.f32 %v797_v60  ;;  %v558_v49 = vmul.f32 0.044715, %v2503_v4 }
 0x168   :  { %v921_v62 = vadd.f32 1.0, %v1684_v57  ;;  %v2514_v11 = vmul.f32 %v618_v39, %v2453_v41  ;;  %v559_v54 = vmul.f32 0.044715, %v2506_v32  ;;  %v2518_v18 = vadd.f32 %v428_v40, %v1921_v47 }
 0x169   :  { %v1030_v21 = vpack.c.bf16 %v986_v61, %v984_v22  ;;  %v2521_v63 = vmul.f32 %v619_v53, %v2458_v2  ;;  %v478_v16 = vmul.f32 0.5, %v2311_v8  ;;  %v475_v27 = vmul.f32 0.5, %v2267_v51 }
 0x16a   :  { %v983_v58 = vmul.f32 %v919_v44, %v471_v1  ;;  %v985_v34 = vmul.f32 %v921_v62, %v473_v7  ;;  %v621_v13 = vmul.f32 %v557_v9, %v2494_v14  ;;  %v477_v39 = vmul.f32 0.5, %v2282_v17 }
 0x16b   :  { %1282 = vmatprep.mubr.bf16.mxu1 %v1030_v21  ;;  %v2528_v19 = vmul.f32 %v620_v12, %v2463_v6  ;;  %v622_v40 = vmul.f32 %v558_v49, %v2503_v4  ;;  %v736_v53 = vadd.f32 %v2376_v31, %v2319_v35  ;;  %v738_v8 = vadd.f32 %v2411_v26, %v2355_v56 }
 0x16c   :  { %v1029_v24 = vpack.c.bf16 %v985_v34, %v983_v58  ;;  %v623_v51 = vmul.f32 %v559_v54, %v2506_v32  ;;  %v560_v1 = vmul.f32 0.044715, %v2518_v18  ;;  %v735_v17 = vadd.f32 %v2373_v28, %v2316_v37 }
 0x16d   :  { %v800_v7 = vmul.f32 0.7978846, %v736_v53  ;;  %v802_v29 = vmul.f32 0.7978846, %v738_v8  ;;  %v2541_v60 = vadd.f32 %v2467_v42, %v1919_v46  ;;  %v737_v31 = vadd.f32 %v2385_v30, %v2332_v5 }
 0x16e   :  { %v1686_v45 = vpop.eup %1685  ;;  %1283 = vmatmul.mubr.bf16.gmra.mrb[32].mxu1 %v1029_v24  ;;  %v2546_v26 = vmul.f32 %v621_v13, %v2494_v14  ;;  %v2549_v22 = vmul.f32 0.5, %v2319_v35  ;;  %v2552_v12 = vmul.f32 0.5, %v2355_v56  ;;  %v799_v28 = vmul.f32 0.7978846, %v735_v17 }
 0x16f   :  { %v1688_v9 = vpop.eup %1687  ;;  %v924_v57 = vadd.f32 1.0, %v1686_v45  ;;  %v2555_v46 = vmul.f32 %v622_v40, %v2503_v4  ;;  %1693 = vtanh.f32 %v800_v7  ;;  %v801_v42 = vmul.f32 0.7978846, %v737_v31 }
 0x170   :  { %v1690_v30 = vpop.eup %1689  ;;  %v926_v61 = vadd.f32 1.0, %v1688_v9  ;;  %v2558_v44 = vmul.f32 %v623_v51, %v2506_v32  ;;  %v624_v49 = vmul.f32 %v560_v1, %v2518_v18  ;;  %1695 = vtanh.f32 %v802_v29 }
 0x171   :  { %v1692_v35 = vpop.eup %1691  ;;  %v923_v62 = vadd.f32 1.0, %v1690_v30  ;;  %v561_v56 = vmul.f32 0.044715, %v2541_v60  ;;  %1697 = vtanh.f32 %v799_v28  ;;  %v2564_v54 = vadd.f32 %v2476_v59, %v1921_v47 }
 0x172   :  { %v988_v21 = vmul.f32 %v924_v57, %v476_v20  ;;  %v990_v58 = vmul.f32 %v926_v61, %v478_v16  ;;  %v925_v34 = vadd.f32 1.0, %v1692_v35  ;;  %1699 = vtanh.f32 %v801_v42 }
 0x173   :  { %v479_v13 = vmul.f32 0.5, %v2316_v37  ;;  %v481_v40 = vmul.f32 0.5, %v2332_v5  ;;  %v740_v53 = vadd.f32 %v2424_v3, %v2369_v10  ;;  %v742_v8 = vadd.f32 %v2470_v38, %v2408_v23 }
 0x174   :  { %v1032_v24 = vpack.c.bf16 %v990_v58, %v988_v21  ;;  %v987_v51 = vmul.f32 %v923_v62, %v475_v27  ;;  %v989_v1 = vmul.f32 %v925_v34, %v477_v39  ;;  %v688_v47 = vmul.f32 %v624_v49, %v2518_v18 }
 0x175   :  { %v804_v59 = vmul.f32 0.7978846, %v740_v53  ;;  %v806_v20 = vmul.f32 0.7978846, %v742_v8  ;;  %v739_v16 = vadd.f32 %v2421_v15, %v2360_v52  ;;  %v741_v37 = vadd.f32 %v2440_v48, %v2390_v55 }
 0x176   :  { %1290 = vmatprep.mubr.bf16.mxu1 %v1032_v24  ;;  %v1031_v5 = vpack.c.bf16 %v989_v1, %v987_v51  ;;  %v625_v3 = vmul.f32 %v561_v56, %v2541_v60  ;;  %v562_v17 = vmul.f32 0.044715, %v2564_v54  ;;  %v744_v38 = vadd.f32 %v2482_v33, %v2418_v0 }
 0x177   :  { %1701 = vtanh.f32 %v804_v59  ;;  %v803_v27 = vmul.f32 0.7978846, %v739_v16  ;;  %v805_v39 = vmul.f32 0.7978846, %v741_v37  ;;  %v746_v7 = vadd.f32 %v2514_v11, %v2453_v41 }
 0x178   :  { %1291 = vmatmul.mubr.bf16.gmra.mrb[36].mxu1 %v1031_v5  ;;  %v484_v15 = vmul.f32 0.5, %v2369_v10  ;;  %v486_v48 = vmul.f32 0.5, %v2408_v23  ;;  %1703 = vtanh.f32 %v806_v20  ;;  %v808_v29 = vmul.f32 0.7978846, %v744_v38 }
 0x179   :  { %v1694_v31 = vpop.eup %1693  ;;  %1705 = vtanh.f32 %v803_v27  ;;  %v810_v45 = vmul.f32 0.7978846, %v746_v7  ;;  %v743_v28 = vadd.f32 %v2473_v50, %v2415_v25  ;;  %v745_v33 = vadd.f32 %v2487_v36, %v2435_v43 }
 0x17a   :  { %v1696_v9 = vpop.eup %1695  ;;  %v928_v57 = vadd.f32 1.0, %v1694_v31  ;;  %v689_v11 = vmul.f32 %v625_v3, %v2541_v60  ;;  %v626_v42 = vmul.f32 %v562_v17, %v2564_v54  ;;  %1707 = vtanh.f32 %v805_v39 }
 0x17b   :  { %v1698_v10 = vpop.eup %1697  ;;  %v930_v23 = vadd.f32 1.0, %v1696_v9  ;;  %1709 = vtanh.f32 %v808_v29  ;;  %v807_v30 = vmul.f32 0.7978846, %v743_v28  ;;  %v809_v61 = vmul.f32 0.7978846, %v745_v33 }
 0x17c   :  { %v1700_v49 = vpop.eup %1699  ;;  %v992_v35 = vmul.f32 %v928_v57, %v2549_v22  ;;  %v927_v62 = vadd.f32 1.0, %v1698_v10  ;;  %1711 = vtanh.f32 %v810_v45  ;;  %v748_v50 = vadd.f32 %v2528_v19, %v2463_v6 }
 0x17d   :  { %v994_v36 = vmul.f32 %v930_v23, %v2552_v12  ;;  %v929_v56 = vadd.f32 1.0, %v1700_v49  ;;  %1713 = vtanh.f32 %v807_v30  ;;  %v750_v21 = vadd.f32 %v2555_v46, %v2503_v4 }
 0x17e   :  { %v690_v58 = vmul.f32 %v626_v42, %v2564_v54  ;;  %v483_v34 = vmul.f32 0.5, %v2360_v52  ;;  %1715 = vtanh.f32 %v809_v61  ;;  %v812_v53 = vmul.f32 0.7978846, %v748_v50 }
 0x17f   :  { %v1034_v8 = vpack.c.bf16 %v994_v36, %v992_v35  ;;  %v991_v22 = vmul.f32 %v927_v62, %v479_v13  ;;  %v993_v24 = vmul.f32 %v929_v56, %v481_v40  ;;  %v814_v51 = vmul.f32 0.7978846, %v750_v21 }
 0x180   :  { %v485_v1 = vmul.f32 0.5, %v2390_v55  ;;  %1717 = vtanh.f32 %v812_v53  ;;  %v747_v19 = vadd.f32 %v2521_v63, %v2458_v2  ;;  %v749_v12 = vadd.f32 %v2546_v26, %v2494_v14 }
 0x181   :  { %v1702_v46 = vpop.eup %1701  ;;  %1298 = vmatprep.mubr.bf16.mxu1 %v1034_v8  ;;  %v1033_v59 = vpack.c.bf16 %v993_v24, %v991_v22  ;;  %v488_v52 = vmul.f32 0.5, %v2418_v0  ;;  %1719 = vtanh.f32 %v814_v51  ;;  %v752_v20 = vadd.f32 %v688_v47, %v2518_v18 }
 0x182   :  { %v1704_v13 = vpop.eup %1703  ;;  %v932_v40 = vadd.f32 1.0, %v1702_v46  ;;  %v811_v16 = vmul.f32 0.7978846, %v747_v19  ;;  %v813_v37 = vmul.f32 0.7978846, %v749_v12  ;;  %v754_v55 = vadd.f32 %v690_v58, %v2564_v54 }
 0x183   :  { %v1706_v5 = vpop.eup %1705  ;;  %1299 = vmatmul.mubr.bf16.gmra.mrb[40].mxu1 %v1033_v59  ;;  %v934_v63 = vadd.f32 1.0, %v1704_v13  ;;  %v490_v3 = vmul.f32 0.5, %v2453_v41  ;;  %v487_v26 = vmul.f32 0.5, %v2415_v25  ;;  %v816_v17 = vmul.f32 0.7978846, %v752_v20 }
 0x184   :  { %v1708_v38 = vpop.eup %1707  ;;  %v996_v27 = vmul.f32 %v932_v40, %v484_v15  ;;  %v931_v0 = vadd.f32 1.0, %v1706_v5  ;;  %1721 = vtanh.f32 %v811_v16  ;;  %v818_v39 = vmul.f32 0.7978846, %v754_v55 }
 0x185   :  { %v1710_v47 = vpop.eup %1709  ;;  %v998_v7 = vmul.f32 %v934_v63, %v486_v48  ;;  %v933_v29 = vadd.f32 1.0, %v1708_v38  ;;  %1723 = vtanh.f32 %v813_v37  ;;  %v751_v31 = vadd.f32 %v2558_v44, %v2506_v32 }
 0x186   :  { %v1712_v45 = vpop.eup %1711  ;;  %v995_v28 = vmul.f32 %v931_v0, %v483_v34  ;;  %v936_v33 = vadd.f32 1.0, %v1710_v47  ;;  %1725 = vtanh.f32 %v816_v17  ;;  %v753_v41 = vadd.f32 %v689_v11, %v2541_v60  ;;  %v2624_v47 = vld [vmem:[%s2790_s4] ss:$0 sm:$0xff] }
 0x187   :  { %v1714_v25 = vpop.eup %1713  ;;  %v1036_v9 = vpack.c.bf16 %v998_v7, %v996_v27  ;;  %v997_v57 = vmul.f32 %v933_v29, %v485_v1  ;;  %v938_v15 = vadd.f32 1.0, %v1712_v45  ;;  %1727 = vtanh.f32 %v818_v39 }
 0x188   :  { %v1716_v42 = vpop.eup %1715  ;;  %v489_v10 = vmul.f32 0.5, %v2435_v43  ;;  %v935_v48 = vadd.f32 1.0, %v1714_v25  ;;  %v815_v23 = vmul.f32 0.7978846, %v751_v31  ;;  %v817_v30 = vmul.f32 0.7978846, %v753_v41 }
 0x189   :  { %1306 = vmatprep.mubr.bf16.mxu1 %v1036_v9  ;;  %v1035_v61 = vpack.c.bf16 %v997_v57, %v995_v28  ;;  %v1000_v44 = vmul.f32 %v936_v33, %v488_v52  ;;  %v1002_v49 = vmul.f32 %v938_v15, %v490_v3  ;;  %v937_v35 = vadd.f32 1.0, %v1716_v42 }
 0x18a   :  { %v1718_v62 = vpop.eup %1717  ;;  %v999_v50 = vmul.f32 %v935_v48, %v487_v26  ;;  %1729 = vtanh.f32 %v815_v23  ;;  %v492_v58 = vmul.f32 0.5, %v2463_v6  ;;  %v494_v43 = vmul.f32 0.5, %v2503_v4 }
 0x18b   :  { %v1720_v11 = vpop.eup %1719  ;;  %1307 = vmatmul.mubr.bf16.gmra.mrb[44].mxu1 %v1035_v61  ;;  %v1038_v36 = vpack.c.bf16 %v1002_v49, %v1000_v44  ;;  %v1001_v56 = vmul.f32 %v937_v35, %v489_v10  ;;  %v940_v21 = vadd.f32 1.0, %v1718_v62  ;;  %1731 = vtanh.f32 %v817_v30 }
 0x18c   :  { %v942_v34 = vadd.f32 1.0, %v1720_v11  ;;  %v491_v46 = vmul.f32 0.5, %v2458_v2  ;;  %v493_v59 = vmul.f32 0.5, %v2494_v14  ;;  %v496_v6 = vmul.f32 0.5, %v2518_v18 }
 0x18d   :  { %1314 = vmatprep.mubr.bf16.mxu1 %v1038_v36  ;;  %v1037_v53 = vpack.c.bf16 %v1001_v56, %v999_v50  ;;  %v1004_v22 = vmul.f32 %v940_v21, %v492_v58  ;;  %v498_v16 = vmul.f32 0.5, %v2564_v54  ;;  %v495_v14 = vmul.f32 0.5, %v2506_v32 }
 0x18e   :  { %v1722_v8 = vpop.eup %1721  ;;  %v1006_v24 = vmul.f32 %v942_v34, %v494_v43  ;;  %v497_v38 = vmul.f32 0.5, %v2541_v60 }
 0x18f   :  { %v1724_v51 = vpop.eup %1723  ;;  %v939_v1 = vadd.f32 1.0, %v1722_v8 }
 0x190   :  { %v1726_v19 = vpop.eup %1725  ;;  %v1040_v12 = vpack.c.bf16 %v1006_v24, %v1004_v22  ;;  %v941_v52 = vadd.f32 1.0, %v1724_v51 }
 0x191   :  { %v1728_v20 = vpop.eup %1727  ;;  %v944_v13 = vadd.f32 1.0, %v1726_v19  ;;  %v1003_v4 = vmul.f32 %v939_v1, %v491_v46 }
 0x192   :  { %v1005_v40 = vmul.f32 %v941_v52, %v493_v59  ;;  %v946_v37 = vadd.f32 1.0, %v1728_v20 }
 0x193   :  { %1315 = vmatmul.mubr.bf16.gmra.mrb[48].mxu1 %v1037_v53  ;;  %v1008_v63 = vmul.f32 %v944_v13, %v496_v6 }
 0x194   :  { %v1730_v55 = vpop.eup %1729  ;;  %1322 = vmatprep.mubr.bf16.mxu1 %v1040_v12  ;;  %v1039_v5 = vpack.c.bf16 %v1005_v40, %v1003_v4  ;;  %v1010_v3 = vmul.f32 %v946_v37, %v498_v16 }
 0x195   :  { %v1732_v26 = vpop.eup %1731  ;;  %v943_v2 = vadd.f32 1.0, %v1730_v55 }
 0x196   :  { %v1042_v17 = vpack.c.bf16 %v1010_v3, %v1008_v63  ;;  %v945_v18 = vadd.f32 1.0, %v1732_v26 }
 0x197   :  { %v1007_v27 = vmul.f32 %v943_v2, %v495_v14 }
 0x198   :  { %v1009_v0 = vmul.f32 %v945_v18, %v497_v38 }
 0x19a   :  { %v1041_v39 = vpack.c.bf16 %v1009_v0, %v1007_v27 }
 0x19b   :  { %1323 = vmatmul.mubr.bf16.gmra.mrb[52].mxu1 %v1039_v5 }
 0x19c   :  { %1330 = vmatprep.mubr.bf16.mxu1 %v1042_v17 }
 0x1a3   :  { %1331 = vmatmul.mubr.bf16.gmra.mrb[56].mxu1 %v1041_v39 }
 0x1da   :  { %v1448_v54 = vpop.f32.mrb[64].mxu0 }
 0x1db   :  { %v1449_v7 = vpop.f32.mrb[65].mxu0 }
 0x1dc   :  { %v1450_v29 = vadd.f32 %v1449_v7, %v1448_v54  ;;  %v1451_v31 = vpop.f32.mrb[66].mxu0 }
 0x1dd   :  { %v1452_v45 = vpop.f32.mrb[67].mxu0 }
 0x1de   :  { %v1213_v32 = vadd.f32 %v1450_v29, %v2624_v47  ;;  %v1453_v60 = vadd.f32 %v1452_v45, %v1451_v31 }
 0x1e0   :  { %1339 = vst.msk [vmem:[%s2791_s5] sm:$0xff] %vm193_vm0, %v1213_v32  ;;  %v1216_v28 = vadd.f32 %v1453_v60, %v2624_v47 }
 0x1e2   :  { %1340 = vst.msk [vmem:[%s2791_s5 + $0x8] sm:$0xff] %vm193_vm0, %v1216_v28 }
 0x1e3   :  { %v1454_v33 = vpop.f32.mrb[0].mxu1 }
 0x1e4   :  { %v1455_v41 = vpop.f32.mrb[1].mxu1 }
 0x1e5   :  { %v1456_v25 = vadd.f32 %v1455_v41, %v1454_v33  ;;  %v1457_v9 = vpop.f32.mrb[2].mxu1 }
 0x1e6   :  { %v1458_v57 = vpop.f32.mrb[3].mxu1 }
 0x1e7   :  { %v1221_v15 = vadd.f32 %v1456_v25, %v2624_v47  ;;  %v1459_v42 = vadd.f32 %v1458_v57, %v1457_v9 }
 0x1e9   :  { %1341 = vst.msk [vmem:[%s2791_s5 + $0x10] sm:$0xff] %vm193_vm0, %v1221_v15  ;;  %v1224_v10 = vadd.f32 %v1459_v42, %v2624_v47 }
 0x1eb   :  { %1342 = vst.msk [vmem:[%s2791_s5 + $0x18] sm:$0xff] %vm193_vm0, %v1224_v10 }
 0x1f3   :  { %v1460_v48 = vpop.f32.mrb[4].mxu1 }
 0x1f4   :  { %v1461_v23 = vpop.f32.mrb[5].mxu1 }
 0x1f5   :  { %v1462_v30 = vadd.f32 %v1461_v23, %v1460_v48  ;;  %v1463_v61 = vpop.f32.mrb[6].mxu1 }
 0x1f6   :  { %v1464_v44 = vpop.f32.mrb[7].mxu1 }
 0x1f7   :  { %v1229_v49 = vadd.f32 %v1462_v30, %v2624_v47  ;;  %v1465_v35 = vadd.f32 %v1464_v44, %v1463_v61 }
 0x1f9   :  { %1343 = vst.msk [vmem:[%s2791_s5 + $0x20] sm:$0xff] %vm193_vm0, %v1229_v49  ;;  %v1232_v62 = vadd.f32 %v1465_v35, %v2624_v47 }
 0x1fb   :  { %1344 = vst.msk [vmem:[%s2791_s5 + $0x28] sm:$0xff] %vm193_vm0, %v1232_v62 }
 0x1fd   :  { %v1466_v50 = vpop.f32.mrb[8].mxu1 }
 0x1fe   :  { %v1467_v11 = vpop.f32.mrb[9].mxu1 }
 0x1ff   :  { %v1468_v36 = vadd.f32 %v1467_v11, %v1466_v50  ;;  %v1469_v56 = vpop.f32.mrb[10].mxu1 }
 0x200   :  { %v1470_v21 = vpop.f32.mrb[11].mxu1 }
 0x201   :  { %v1237_v58 = vadd.f32 %v1468_v36, %v2624_v47  ;;  %v1471_v43 = vadd.f32 %v1470_v21, %v1469_v56 }
 0x203   :  { %1345 = vst.msk [vmem:[%s2791_s5 + $0x30] sm:$0xff] %vm193_vm0, %v1237_v58  ;;  %v1240_v34 = vadd.f32 %v1471_v43, %v2624_v47 }
 0x205   :  { %1346 = vst.msk [vmem:[%s2791_s5 + $0x38] sm:$0xff] %vm193_vm0, %v1240_v34 }
 0x20a   :  { %v1472_v53 = vpop.f32.mrb[12].mxu1 }
 0x20b   :  { %v1473_v8 = vpop.f32.mrb[13].mxu1 }
 0x20c   :  { %v1474_v22 = vadd.f32 %v1473_v8, %v1472_v53  ;;  %v1475_v24 = vpop.f32.mrb[14].mxu1 }
 0x20d   :  { %v1476_v51 = vpop.f32.mrb[15].mxu1 }
 0x20e   :  { %v1245_v1 = vadd.f32 %v1474_v22, %v2624_v47  ;;  %v1477_v19 = vadd.f32 %v1476_v51, %v1475_v24 }
 0x210   :  { %1347 = vst.msk [vmem:[%s2791_s5 + $0x40] sm:$0xff] %vm193_vm0, %v1245_v1  ;;  %v1248_v12 = vadd.f32 %v1477_v19, %v2624_v47 }
 0x212   :  { %1348 = vst.msk [vmem:[%s2791_s5 + $0x48] sm:$0xff] %vm193_vm0, %v1248_v12 }
 0x218   :  { %v1478_v46 = vpop.f32.mrb[16].mxu1 }
 0x219   :  { %v1479_v59 = vpop.f32.mrb[17].mxu1 }
 0x21a   :  { %v1480_v52 = vadd.f32 %v1479_v59, %v1478_v46  ;;  %v1481_v20 = vpop.f32.mrb[18].mxu1 }
 0x21b   :  { %v1482_v6 = vpop.f32.mrb[19].mxu1 }
 0x21c   :  { %v1253_v13 = vadd.f32 %v1480_v52, %v2624_v47  ;;  %v1483_v4 = vadd.f32 %v1482_v6, %v1481_v20 }
 0x21e   :  { %1349 = vst.msk [vmem:[%s2791_s5 + $0x50] sm:$0xff] %vm193_vm0, %v1253_v13  ;;  %v1256_v40 = vadd.f32 %v1483_v4, %v2624_v47 }
 0x220   :  { %1350 = vst.msk [vmem:[%s2791_s5 + $0x58] sm:$0xff] %vm193_vm0, %v1256_v40 }
 0x222   :  { %v1484_v16 = vpop.f32.mrb[20].mxu1 }
 0x223   :  { %v1485_v37 = vpop.f32.mrb[21].mxu1 }
 0x224   :  { %v1486_v55 = vadd.f32 %v1485_v37, %v1484_v16  ;;  %v1487_v5 = vpop.f32.mrb[22].mxu1 }
 0x225   :  { %v1488_v63 = vpop.f32.mrb[23].mxu1 }
 0x226   :  { %v1261_v3 = vadd.f32 %v1486_v55, %v2624_v47  ;;  %v1489_v26 = vadd.f32 %v1488_v63, %v1487_v5 }
 0x228   :  { %1351 = vst.msk [vmem:[%s2791_s5 + $0x60] sm:$0xff] %vm193_vm0, %v1261_v3  ;;  %v1264_v2 = vadd.f32 %v1489_v26, %v2624_v47 }
 0x22a   :  { %1352 = vst.msk [vmem:[%s2791_s5 + $0x68] sm:$0xff] %vm193_vm0, %v1264_v2 }
 0x22d   :  { %v1490_v17 = vpop.f32.mrb[24].mxu1 }
 0x22e   :  { %v1491_v14 = vpop.f32.mrb[25].mxu1 }
 0x22f   :  { %v1492_v38 = vadd.f32 %v1491_v14, %v1490_v17  ;;  %v1493_v18 = vpop.f32.mrb[26].mxu1 }
 0x230   :  { %v1494_v27 = vpop.f32.mrb[27].mxu1 }
 0x231   :  { %v1269_v0 = vadd.f32 %v1492_v38, %v2624_v47  ;;  %v1495_v39 = vadd.f32 %v1494_v27, %v1493_v18 }
 0x233   :  { %1353 = vst.msk [vmem:[%s2791_s5 + $0x70] sm:$0xff] %vm193_vm0, %v1269_v0  ;;  %v1272_v54 = vadd.f32 %v1495_v39, %v2624_v47 }
 0x235   :  { %1354 = vst.msk [vmem:[%s2791_s5 + $0x78] sm:$0xff] %vm193_vm0, %v1272_v54 }
 0x237   :  { %v1496_v7 = vpop.f32.mrb[28].mxu1 }
 0x238   :  { %v1497_v29 = vpop.f32.mrb[29].mxu1 }
 0x239   :  { %v1498_v31 = vadd.f32 %v1497_v29, %v1496_v7  ;;  %v1499_v45 = vpop.f32.mrb[30].mxu1 }
 0x23a   :  { %v1500_v32 = vpop.f32.mrb[31].mxu1 }
 0x23b   :  { %v1277_v60 = vadd.f32 %v1498_v31, %v2624_v47  ;;  %v1501_v28 = vadd.f32 %v1500_v32, %v1499_v45 }
 0x23d   :  { %1355 = vst.msk [vmem:[%s2791_s5 + $0x80] sm:$0xff] %vm193_vm0, %v1277_v60  ;;  %v1280_v33 = vadd.f32 %v1501_v28, %v2624_v47 }
 0x23f   :  { %1356 = vst.msk [vmem:[%s2791_s5 + $0x88] sm:$0xff] %vm193_vm0, %v1280_v33 }
 0x241   :  { %v1502_v41 = vpop.f32.mrb[32].mxu1 }
 0x242   :  { %v1503_v25 = vpop.f32.mrb[33].mxu1 }
 0x243   :  { %v1504_v9 = vadd.f32 %v1503_v25, %v1502_v41  ;;  %v1505_v57 = vpop.f32.mrb[34].mxu1 }
 0x244   :  { %v1506_v15 = vpop.f32.mrb[35].mxu1 }
 0x245   :  { %v1285_v42 = vadd.f32 %v1504_v9, %v2624_v47  ;;  %v1507_v10 = vadd.f32 %v1506_v15, %v1505_v57 }
 0x247   :  { %1357 = vst.msk [vmem:[%s2791_s5 + $0x90] sm:$0xff] %vm193_vm0, %v1285_v42  ;;  %v1288_v48 = vadd.f32 %v1507_v10, %v2624_v47 }
 0x249   :  { %1358 = vst.msk [vmem:[%s2791_s5 + $0x98] sm:$0xff] %vm193_vm0, %v1288_v48 }
 0x24b   :  { %v1508_v23 = vpop.f32.mrb[36].mxu1 }
 0x24c   :  { %v1509_v30 = vpop.f32.mrb[37].mxu1 }
 0x24d   :  { %v1510_v61 = vadd.f32 %v1509_v30, %v1508_v23  ;;  %v1511_v44 = vpop.f32.mrb[38].mxu1 }
 0x24e   :  { %v1512_v49 = vpop.f32.mrb[39].mxu1 }
 0x24f   :  { %v1293_v35 = vadd.f32 %v1510_v61, %v2624_v47  ;;  %v1513_v62 = vadd.f32 %v1512_v49, %v1511_v44 }
 0x251   :  { %1359 = vst.msk [vmem:[%s2791_s5 + $0xa0] sm:$0xff] %vm193_vm0, %v1293_v35  ;;  %v1296_v50 = vadd.f32 %v1513_v62, %v2624_v47 }
 0x253   :  { %1360 = vst.msk [vmem:[%s2791_s5 + $0xa8] sm:$0xff] %vm193_vm0, %v1296_v50 }
 0x256   :  { %v1514_v11 = vpop.f32.mrb[40].mxu1 }
 0x257   :  { %v1515_v36 = vpop.f32.mrb[41].mxu1 }
 0x258   :  { %v1516_v56 = vadd.f32 %v1515_v36, %v1514_v11  ;;  %v1517_v21 = vpop.f32.mrb[42].mxu1 }
 0x259   :  { %v1518_v58 = vpop.f32.mrb[43].mxu1 }
 0x25a   :  { %v1301_v43 = vadd.f32 %v1516_v56, %v2624_v47  ;;  %v1519_v34 = vadd.f32 %v1518_v58, %v1517_v21 }
 0x25c   :  { %1361 = vst.msk [vmem:[%s2791_s5 + $0xb0] sm:$0xff] %vm193_vm0, %v1301_v43  ;;  %v1304_v53 = vadd.f32 %v1519_v34, %v2624_v47 }
 0x25e   :  { %1362 = vst.msk [vmem:[%s2791_s5 + $0xb8] sm:$0xff] %vm193_vm0, %v1304_v53  ;;  %v1520_v8 = vpop.f32.mrb[44].mxu1 }
 0x25f   :  { %v1521_v22 = vpop.f32.mrb[45].mxu1 }
 0x260   :  { %v1522_v24 = vadd.f32 %v1521_v22, %v1520_v8  ;;  %v1523_v51 = vpop.f32.mrb[46].mxu1 }
 0x261   :  { %v1524_v1 = vpop.f32.mrb[47].mxu1 }
 0x262   :  { %v1309_v19 = vadd.f32 %v1522_v24, %v2624_v47  ;;  %v1525_v12 = vadd.f32 %v1524_v1, %v1523_v51 }
 0x264   :  { %1363 = vst.msk [vmem:[%s2791_s5 + $0xc0] sm:$0xff] %vm193_vm0, %v1309_v19  ;;  %v1312_v46 = vadd.f32 %v1525_v12, %v2624_v47 }
 0x266   :  { %1364 = vst.msk [vmem:[%s2791_s5 + $0xc8] sm:$0xff] %vm193_vm0, %v1312_v46  ;;  %v1526_v59 = vpop.f32.mrb[48].mxu1 }
 0x267   :  { %v1527_v52 = vpop.f32.mrb[49].mxu1 }
 0x268   :  { %v1528_v20 = vadd.f32 %v1527_v52, %v1526_v59  ;;  %v1529_v6 = vpop.f32.mrb[50].mxu1 }
 0x269   :  { %v1530_v13 = vpop.f32.mrb[51].mxu1 }
 0x26a   :  { %v1317_v4 = vadd.f32 %v1528_v20, %v2624_v47  ;;  %v1531_v40 = vadd.f32 %v1530_v13, %v1529_v6 }
 0x26c   :  { %1365 = vst.msk [vmem:[%s2791_s5 + $0xd0] sm:$0xff] %vm193_vm0, %v1317_v4  ;;  %v1320_v16 = vadd.f32 %v1531_v40, %v2624_v47 }
 0x26e   :  { %1366 = vst.msk [vmem:[%s2791_s5 + $0xd8] sm:$0xff] %vm193_vm0, %v1320_v16  ;;  %v1532_v37 = vpop.f32.mrb[52].mxu1 }
 0x26f   :  { %v1533_v55 = vpop.f32.mrb[53].mxu1 }
 0x270   :  { %v1534_v5 = vadd.f32 %v1533_v55, %v1532_v37  ;;  %v1535_v63 = vpop.f32.mrb[54].mxu1 }
 0x271   :  { %v1536_v3 = vpop.f32.mrb[55].mxu1 }
 0x272   :  { %v1325_v26 = vadd.f32 %v1534_v5, %v2624_v47  ;;  %v1537_v2 = vadd.f32 %v1536_v3, %v1535_v63 }
 0x274   :  { %1367 = vst.msk [vmem:[%s2791_s5 + $0xe0] sm:$0xff] %vm193_vm0, %v1325_v26  ;;  %v1328_v17 = vadd.f32 %v1537_v2, %v2624_v47 }
 0x276   :  { %1368 = vst.msk [vmem:[%s2791_s5 + $0xe8] sm:$0xff] %vm193_vm0, %v1328_v17  ;;  %v1538_v14 = vpop.f32.mrb[56].mxu1 }
 0x277   :  { %v1539_v38 = vpop.f32.mrb[57].mxu1 }
 0x278   :  { %v1540_v18 = vadd.f32 %v1539_v38, %v1538_v14  ;;  %v1541_v27 = vpop.f32.mrb[58].mxu1 }
 0x279   :  { %v1542_v0 = vpop.f32.mrb[59].mxu1 }
 0x27a   :  { %v1333_v39 = vadd.f32 %v1540_v18, %v2624_v47  ;;  %v1543_v54 = vadd.f32 %v1542_v0, %v1541_v27 }
 0x27c   :  { %1369 = vst.msk [vmem:[%s2791_s5 + $0xf0] sm:$0xff] %vm193_vm0, %v1333_v39  ;;  %v1336_v7 = vadd.f32 %v1543_v54, %v2624_v47 }
 0x27e   :  { %1370 = vst.msk [vmem:[%s2791_s5 + $0xf8] sm:$0xff] %vm193_vm0, %v1336_v7 }

</bundles_post_ra>
